<compile_context>
chip_gen: v7x
topology: tpu7x:2x2x1
jax: 0.10.0
libtpu: 0.0.40
codegen_flags: <defaults>
</compile_context>

<pallas_src>
import functools

import jax
import jax.numpy as jnp
from jax.experimental import pallas as pl
from jax.experimental.pallas import tpu as pltpu

EPS = 1e-5
D = 512           # hidden width of every Linear layer
OUT_PAD = 128     # lane-dense padding for the final 1-wide output
N_HIDDEN = 4      # number of Linear->BN->ReLU blocks


def domain_classifier_kernel(x_ref, w_ref, bn_ref, w5_ref, b5_ref,
                             out_ref, h_ref, *, layers_per_step):
    """One grid step == `layers_per_step` Linear->BN->ReLU blocks; the last
    step also runs the final Linear(512, 1) epilogue."""
    step = pl.program_id(0)
    n_steps = pl.num_programs(0)

    @pl.when(step == 0)
    def _():
        # grad_reverse(z, lamda) is the identity in the forward pass.
        h_ref[...] = x_ref[...]          # already bf16 (cast in the wrapper)

    h_bf = h_ref[...]
    for j in range(layers_per_step):     # static, fully unrolled
        # Linear.  Hidden bias omitted: BatchNorm's batch-mean subtraction
        # cancels it exactly in training mode (forward output unchanged).
        z = jnp.dot(h_bf, w_ref[j], preferred_element_type=jnp.float32)

        # BatchNorm1d with batch statistics (module default .training=True).
        # TODO(synk): eval-mode running-stat BatchNorm path not implemented.
        mu = jnp.mean(z, axis=0, keepdims=True)
        d = z - mu
        var = jnp.mean(d * d, axis=0, keepdims=True)      # mean-shifted var
        bn = bn_ref[j]                                     # (2, 512) f32
        scale = bn[0:1, :] * jax.lax.rsqrt(var + EPS)      # gamma/sqrt(var+eps)

        # Fused BN affine + ReLU in bf16 (stats stay f32): h = max(d*s + b, 0).
        h_bf = jnp.maximum(
            d.astype(jnp.bfloat16) * scale.astype(jnp.bfloat16)
            + bn[1:2, :].astype(jnp.bfloat16),
            0.0)

    h_ref[...] = h_bf                    # persist activation across grid steps

    @pl.when(step == n_steps - 1)
    def _():
        # Final Linear(512, 1), zero-padded to 128 lanes, bf16 writeback.
        out_ref[...] = (jnp.dot(h_bf, w5_ref[...],
                                preferred_element_type=jnp.float32)
                        + b5_ref[...]).astype(out_ref.dtype)


def init_params(key):
    """Deterministic init in the spirit of PyTorch defaults.

    BN gamma/beta are randomized (rather than 1/0) so the affine path is
    actually exercised by the correctness check."""
    k_w, k_g, k_b, k_w5, k_b5 = jax.random.split(key, 5)
    bound = 1.0 / (D ** 0.5)

    # 4 hidden Linear weights, stored (in_features, out_features), bf16.
    w_stack = jax.random.uniform(
        k_w, (N_HIDDEN, D, D), jnp.float32, -bound, bound).astype(jnp.bfloat16)

    # BN params stacked: [:, 0, :] = gamma, [:, 1, :] = beta  (f32).
    gamma = jax.random.uniform(k_g, (N_HIDDEN, D), jnp.float32, 0.5, 1.5)
    beta = 0.1 * jax.random.normal(k_b, (N_HIDDEN, D), jnp.float32)
    bn_stack = jnp.stack([gamma, beta], axis=1)            # (4, 2, 512)

    # Final Linear(512, 1), zero-padded to (512, OUT_PAD) / (1, OUT_PAD).
    w5 = jax.random.uniform(k_w5, (D, 1), jnp.float32, -bound, bound)
    b5 = jax.random.uniform(k_b5, (1, 1), jnp.float32, -bound, bound)
    w5p = jnp.zeros((D, OUT_PAD), jnp.float32).at[:, :1].set(w5).astype(jnp.bfloat16)
    b5p = jnp.zeros((1, OUT_PAD), jnp.float32).at[:, :1].set(b5)

    return w_stack, bn_stack, w5p, b5p


@functools.partial(jax.jit, static_argnames=("layers_per_step",))
def domain_classifier(z, w_stack, bn_stack, w5p, b5p, lamda=0.1, *,
                      layers_per_step=2):
    # `lamda` only affects the backward pass of grad_reverse; unused here.
    del lamda
    assert N_HIDDEN % layers_per_step == 0
    n_steps = N_HIDDEN // layers_per_step      # 2 portable; 1 (=4 layers) on v7x
    B = z.shape[0]
    z_bf = z.astype(jnp.bfloat16)              # halve the z HBM read

    out_padded = pl.pallas_call(
        functools.partial(domain_classifier_kernel,
                          layers_per_step=layers_per_step),
        out_shape=jax.ShapeDtypeStruct((B, OUT_PAD), jnp.bfloat16),
        grid_spec=pltpu.PrefetchScalarGridSpec(
            num_scalar_prefetch=0,
            grid=(n_steps,),
            in_specs=[
                # z: DMA'd once, resident across the layer axis.
                pl.BlockSpec((B, D), lambda s: (0, 0)),
                # per-step weight slab: pipelined (prefetch s+1 during s).
                pl.BlockSpec((layers_per_step, D, D), lambda s: (s, 0, 0)),
                # per-step BN gammas/betas (tiny).
                pl.BlockSpec((layers_per_step, 2, D), lambda s: (s, 0, 0)),
                # padded final weight / bias: resident.
                pl.BlockSpec((D, OUT_PAD), lambda s: (0, 0)),
                pl.BlockSpec((1, OUT_PAD), lambda s: (0, 0)),
            ],
            out_specs=pl.BlockSpec((B, OUT_PAD), lambda s: (0, 0)),
            scratch_shapes=[pltpu.VMEM((B, D), jnp.bfloat16)],   # persistent h
        ),
        compiler_params=pltpu.CompilerParams(
            dimension_semantics=("arbitrary",),   # layer axis carries h
            vmem_limit_bytes=16 << 20,            # ~2-4 MiB actual use + headroom
        ),
    )(z_bf, w_stack, bn_stack, w5p, b5p)

    return out_padded[:, :1].astype(jnp.float32)   # (B, 1), like nn.Linear(512,1)


def reference_mirror(z, w_stack, bn_stack, w5p, b5p):
    """Plain-JAX reference mirroring the kernel's numerics exactly (bf16
    operands, f32 accumulation, bf16 fused affine+ReLU, bf16 writeback)."""
    h = z.astype(jnp.bfloat16)
    for l in range(N_HIDDEN):
        zz = jnp.dot(h, w_stack[l], preferred_element_type=jnp.float32)
        mu = zz.mean(axis=0, keepdims=True)
        d = zz - mu
        var = (d * d).mean(axis=0, keepdims=True)
        scale = bn_stack[l, 0:1, :] * jax.lax.rsqrt(var + EPS)
        h = jnp.maximum(d.astype(jnp.bfloat16) * scale.astype(jnp.bfloat16)
                        + bn_stack[l, 1:2, :].astype(jnp.bfloat16), 0.0)
    out = jnp.dot(h, w5p, preferred_element_type=jnp.float32) + b5p
    return out[:, :1].astype(jnp.bfloat16).astype(jnp.float32)


def reference_f32(z, w_stack, bn_stack, w5p, b5p):
    """Full-f32 forward matching the PyTorch DomainClassifier in training mode
    (batch-stat BatchNorm; hidden Linear biases cancel exactly there)."""
    h = z.astype(jnp.float32)
    for l in range(N_HIDDEN):
        zz = h @ w_stack[l].astype(jnp.float32)
        mu = zz.mean(axis=0, keepdims=True)
        var = ((zz - mu) ** 2).mean(axis=0, keepdims=True)
        zn = (zz - mu) * jax.lax.rsqrt(var + EPS)
        h = jnp.maximum(zn * bn_stack[l, 0, :] + bn_stack[l, 1, :], 0.0)
    out = h @ w5p.astype(jnp.float32) + b5p
    return out[:, :1]


if __name__ == "__main__":
    key = jax.random.PRNGKey(0)
    k_x, k_p = jax.random.split(key)
    B = 16                                  # multiple of 8; >1 for BN stats
    z = jax.random.normal(k_x, (B, D), jnp.float32)
    params = init_params(k_p)

    out = jax.block_until_ready(domain_classifier(z, *params))
    assert out.shape == (B, 1)

    # Tight check against the kernel-mirroring reference.
    ref = reference_mirror(z, *params)
    assert jnp.allclose(out, ref, atol=1e-2, rtol=1e-2), (out, ref)

    # Loose check against the true f32 (PyTorch-faithful, training-mode) math.
    ref32 = reference_f32(z, *params)
    assert jnp.allclose(out, ref32, atol=1e-1, rtol=1e-1), (out, ref32)

    print("KERNEL_OK")
</pallas_src>

<mosaic_0001>
module attributes {stable_mosaic.version = 11 : i64} {
  func.func @domain_classifier_kernel(%arg0: i32, %arg1: memref<16x512xbf16, #tpu.memory_space<vmem>>, %arg2: memref<2x512x512xbf16, #tpu.memory_space<vmem>>, %arg3: memref<2x2x512xf32, #tpu.memory_space<vmem>>, %arg4: memref<512x128xbf16, #tpu.memory_space<vmem>>, %arg5: memref<1x128xf32, #tpu.memory_space<vmem>>, %arg6: memref<16x128xbf16, #tpu.memory_space<vmem>>, %arg7: memref<16x512xbf16, #tpu.memory_space<vmem>>) attributes {dimension_semantics = [#tpu.dimension_semantics<arbitrary>], iteration_bounds = array<i64: 2>, scalar_prefetch = 0 : i64, scratch_operands = 1 : i64, tpu.core_type = #tpu.core_type<tc>, window_params = [{pipeline_mode = #tpu.pipeline_mode<synchronous>, transform_indices = @transform_0, window_bounds = array<i64: 16, 512>}, {transform_indices = @transform_1, window_bounds = array<i64: 2, 512, 512>}, {transform_indices = @transform_2, window_bounds = array<i64: 2, 2, 512>}, {pipeline_mode = #tpu.pipeline_mode<synchronous>, transform_indices = @transform_3, window_bounds = array<i64: 512, 128>}, {pipeline_mode = #tpu.pipeline_mode<synchronous>, transform_indices = @transform_4, window_bounds = array<i64: 1, 128>}, {pipeline_mode = #tpu.pipeline_mode<synchronous>, transform_indices = @transform_5, window_bounds = array<i64: 16, 128>}]} {
    %c0_i32 = arith.constant 0 : i32
    %0 = arith.cmpi eq, %arg0, %c0_i32 : i32
    %1 = arith.extui %0 : i1 to i32
    %c0_i32_0 = arith.constant 0 : i32
    %2 = arith.cmpi ne, %1, %c0_i32_0 : i32
    scf.if %2 {
      %c0_29 = arith.constant 0 : index
      %c0_30 = arith.constant 0 : index
      %70 = vector.load %arg1[%c0_29, %c0_30] : memref<16x512xbf16, #tpu.memory_space<vmem>>, vector<16x512xbf16>
      %c0_31 = arith.constant 0 : index
      %c0_32 = arith.constant 0 : index
      %71 = vector.load %arg7[%c0_31, %c0_32] : memref<16x512xbf16, #tpu.memory_space<vmem>>, vector<16x512xbf16>
      tpu.vector_store %arg7[%c0_31, %c0_32], %70 {strides = array<i32>} : memref<16x512xbf16, #tpu.memory_space<vmem>>, vector<16x512xbf16>,
    } else {
    }
    %c0 = arith.constant 0 : index
    %c0_1 = arith.constant 0 : index
    %3 = vector.load %arg7[%c0, %c0_1] : memref<16x512xbf16, #tpu.memory_space<vmem>>, vector<16x512xbf16>
    %c0_2 = arith.constant 0 : index
    %c0_3 = arith.constant 0 : index
    %c0_4 = arith.constant 0 : index
    %4 = vector.load %arg2[%c0_2, %c0_3, %c0_4] : memref<2x512x512xbf16, #tpu.memory_space<vmem>>, vector<1x512x512xbf16>
    %5 = vector.shape_cast %4 : vector<1x512x512xbf16> to vector<512x512xbf16>
    %cst = arith.constant dense<0.000000e+00> : vector<16x512xf32>
    %6 = tpu.matmul %3, %5, %cst {dimension_numbers = #tpu.dot_dimension_numbers<[1], [0], [0], [1], [0, 0, 1, 1], [], []>} : vector<16x512xbf16>, vector<512x512xbf16>, vector<16x512xf32> -> vector<16x512xf32>
    %cst_5 = arith.constant dense<0.000000e+00> : vector<512xf32>
    %7 = vector.multi_reduction <add>, %6, %cst_5 [0] : vector<16x512xf32> to vector<512xf32>
    %8 = vector.shape_cast %7 : vector<512xf32> to vector<1x512xf32>
    %cst_6 = arith.constant 1.600000e+01 : f32
    %9 = vector.broadcast %cst_6 : f32 to vector<1x512xf32>
    %10 = arith.divf %8, %9 : vector<1x512xf32>
    %11 = vector.broadcast %10 : vector<1x512xf32> to vector<16x512xf32>
    %12 = arith.subf %6, %11 : vector<16x512xf32>
    %13 = arith.mulf %12, %12 : vector<16x512xf32>
    %cst_7 = arith.constant dense<0.000000e+00> : vector<512xf32>
    %14 = vector.multi_reduction <add>, %13, %cst_7 [0] : vector<16x512xf32> to vector<512xf32>
    %15 = vector.shape_cast %14 : vector<512xf32> to vector<1x512xf32>
    %cst_8 = arith.constant 1.600000e+01 : f32
    %16 = vector.broadcast %cst_8 : f32 to vector<1x512xf32>
    %17 = arith.divf %15, %16 : vector<1x512xf32>
    %c0_9 = arith.constant 0 : index
    %c0_10 = arith.constant 0 : index
    %c0_11 = arith.constant 0 : index
    %18 = vector.load %arg3[%c0_9, %c0_10, %c0_11] : memref<2x2x512xf32, #tpu.memory_space<vmem>>, vector<1x2x512xf32>
    %19 = vector.shape_cast %18 : vector<1x2x512xf32> to vector<2x512xf32>
    %20 = vector.extract_strided_slice %19 {offsets = [0, 0], sizes = [1, 512], strides = [1, 1]} : vector<2x512xf32> to vector<1x512xf32>
    %cst_12 = arith.constant 9.99999974E-6 : f32
    %21 = vector.broadcast %cst_12 : f32 to vector<1x512xf32>
    %22 = arith.addf %17, %21 : vector<1x512xf32>
    %23 = math.rsqrt %22 : vector<1x512xf32>
    %24 = arith.mulf %20, %23 : vector<1x512xf32>
    %25 = arith.truncf %12 : vector<16x512xf32> to vector<16x512xbf16>
    %26 = arith.truncf %24 : vector<1x512xf32> to vector<1x512xbf16>
    %27 = vector.broadcast %26 : vector<1x512xbf16> to vector<16x512xbf16>
    %28 = arith.mulf %25, %27 : vector<16x512xbf16>
    %29 = vector.extract_strided_slice %19 {offsets = [1, 0], sizes = [1, 512], strides = [1, 1]} : vector<2x512xf32> to vector<1x512xf32>
    %30 = arith.truncf %29 : vector<1x512xf32> to vector<1x512xbf16>
    %31 = vector.broadcast %30 : vector<1x512xbf16> to vector<16x512xbf16>
    %32 = arith.addf %28, %31 : vector<16x512xbf16>
    %cst_13 = arith.constant 0.000000e+00 : bf16
    %33 = vector.broadcast %cst_13 : bf16 to vector<16x512xbf16>
    %34 = arith.maximumf %32, %33 : vector<16x512xbf16>
    %c1 = arith.constant 1 : index
    %c0_14 = arith.constant 0 : index
    %c0_15 = arith.constant 0 : index
    %35 = vector.load %arg2[%c1, %c0_14, %c0_15] : memref<2x512x512xbf16, #tpu.memory_space<vmem>>, vector<1x512x512xbf16>
    %36 = vector.shape_cast %35 : vector<1x512x512xbf16> to vector<512x512xbf16>
    %cst_16 = arith.constant dense<0.000000e+00> : vector<16x512xf32>
    %37 = tpu.matmul %34, %36, %cst_16 {dimension_numbers = #tpu.dot_dimension_numbers<[1], [0], [0], [1], [0, 0, 1, 1], [], []>} : vector<16x512xbf16>, vector<512x512xbf16>, vector<16x512xf32> -> vector<16x512xf32>
    %cst_17 = arith.constant dense<0.000000e+00> : vector<512xf32>
    %38 = vector.multi_reduction <add>, %37, %cst_17 [0] : vector<16x512xf32> to vector<512xf32>
    %39 = vector.shape_cast %38 : vector<512xf32> to vector<1x512xf32>
    %cst_18 = arith.constant 1.600000e+01 : f32
    %40 = vector.broadcast %cst_18 : f32 to vector<1x512xf32>
    %41 = arith.divf %39, %40 : vector<1x512xf32>
    %42 = vector.broadcast %41 : vector<1x512xf32> to vector<16x512xf32>
    %43 = arith.subf %37, %42 : vector<16x512xf32>
    %44 = arith.mulf %43, %43 : vector<16x512xf32>
    %cst_19 = arith.constant dense<0.000000e+00> : vector<512xf32>
    %45 = vector.multi_reduction <add>, %44, %cst_19 [0] : vector<16x512xf32> to vector<512xf32>
    %46 = vector.shape_cast %45 : vector<512xf32> to vector<1x512xf32>
    %cst_20 = arith.constant 1.600000e+01 : f32
    %47 = vector.broadcast %cst_20 : f32 to vector<1x512xf32>
    %48 = arith.divf %46, %47 : vector<1x512xf32>
    %c1_21 = arith.constant 1 : index
    %c0_22 = arith.constant 0 : index
    %c0_23 = arith.constant 0 : index
    %49 = vector.load %arg3[%c1_21, %c0_22, %c0_23] : memref<2x2x512xf32, #tpu.memory_space<vmem>>, vector<1x2x512xf32>
    %50 = vector.shape_cast %49 : vector<1x2x512xf32> to vector<2x512xf32>
    %51 = vector.extract_strided_slice %50 {offsets = [0, 0], sizes = [1, 512], strides = [1, 1]} : vector<2x512xf32> to vector<1x512xf32>
    %cst_24 = arith.constant 9.99999974E-6 : f32
    %52 = vector.broadcast %cst_24 : f32 to vector<1x512xf32>
    %53 = arith.addf %48, %52 : vector<1x512xf32>
    %54 = math.rsqrt %53 : vector<1x512xf32>
    %55 = arith.mulf %51, %54 : vector<1x512xf32>
    %56 = arith.truncf %43 : vector<16x512xf32> to vector<16x512xbf16>
    %57 = arith.truncf %55 : vector<1x512xf32> to vector<1x512xbf16>
    %58 = vector.broadcast %57 : vector<1x512xbf16> to vector<16x512xbf16>
    %59 = arith.mulf %56, %58 : vector<16x512xbf16>
    %60 = vector.extract_strided_slice %50 {offsets = [1, 0], sizes = [1, 512], strides = [1, 1]} : vector<2x512xf32> to vector<1x512xf32>
    %61 = arith.truncf %60 : vector<1x512xf32> to vector<1x512xbf16>
    %62 = vector.broadcast %61 : vector<1x512xbf16> to vector<16x512xbf16>
    %63 = arith.addf %59, %62 : vector<16x512xbf16>
    %cst_25 = arith.constant 0.000000e+00 : bf16
    %64 = vector.broadcast %cst_25 : bf16 to vector<16x512xbf16>
    %65 = arith.maximumf %63, %64 : vector<16x512xbf16>
    %c0_26 = arith.constant 0 : index
    %c0_27 = arith.constant 0 : index
    %66 = vector.load %arg7[%c0_26, %c0_27] : memref<16x512xbf16, #tpu.memory_space<vmem>>, vector<16x512xbf16>
    tpu.vector_store %arg7[%c0_26, %c0_27], %65 {strides = array<i32>} : memref<16x512xbf16, #tpu.memory_space<vmem>>, vector<16x512xbf16>,
    %c1_i32 = arith.constant 1 : i32
    %67 = arith.cmpi eq, %arg0, %c1_i32 : i32
    %68 = arith.extui %67 : i1 to i32
    %c0_i32_28 = arith.constant 0 : i32
    %69 = arith.cmpi ne, %68, %c0_i32_28 : i32
    scf.if %69 {
      %c0_29 = arith.constant 0 : index
      %c0_30 = arith.constant 0 : index
      %70 = vector.load %arg4[%c0_29, %c0_30] : memref<512x128xbf16, #tpu.memory_space<vmem>>, vector<512x128xbf16>
      %cst_31 = arith.constant dense<0.000000e+00> : vector<16x128xf32>
      %71 = tpu.matmul %65, %70, %cst_31 {dimension_numbers = #tpu.dot_dimension_numbers<[1], [0], [0], [1], [0, 0, 1, 1], [], []>} : vector<16x512xbf16>, vector<512x128xbf16>, vector<16x128xf32> -> vector<16x128xf32>
      %c0_32 = arith.constant 0 : index
      %c0_33 = arith.constant 0 : index
      %72 = vector.load %arg5[%c0_32, %c0_33] : memref<1x128xf32, #tpu.memory_space<vmem>>, vector<1x128xf32>
      %73 = vector.broadcast %72 : vector<1x128xf32> to vector<16x128xf32>
      %74 = arith.addf %71, %73 : vector<16x128xf32>
      %75 = arith.truncf %74 : vector<16x128xf32> to vector<16x128xbf16>
      %c0_34 = arith.constant 0 : index
      %c0_35 = arith.constant 0 : index
      %76 = vector.load %arg6[%c0_34, %c0_35] : memref<16x128xbf16, #tpu.memory_space<vmem>>, vector<16x128xbf16>
      tpu.vector_store %arg6[%c0_34, %c0_35], %75 {strides = array<i32>} : memref<16x128xbf16, #tpu.memory_space<vmem>>, vector<16x128xbf16>,
    } else {
    }
    return
  }
  func.func @transform_0(%arg0: i32) -> (i32, i32) {
    %c0_i32 = arith.constant 0 : i32
    %c0_i32_0 = arith.constant 0 : i32
    %c0_i32_1 = arith.constant 0 : i32
    return %c0_i32, %c0_i32_0 : i32, i32
  }
  func.func @transform_1(%arg0: i32) -> (i32, i32, i32) {
    %c0_i32 = arith.constant 0 : i32
    %c0_i32_0 = arith.constant 0 : i32
    %c0_i32_1 = arith.constant 0 : i32
    return %arg0, %c0_i32, %c0_i32_0 : i32, i32, i32
  }
  func.func @transform_2(%arg0: i32) -> (i32, i32, i32) {
    %c0_i32 = arith.constant 0 : i32
    %c0_i32_0 = arith.constant 0 : i32
    %c0_i32_1 = arith.constant 0 : i32
    return %arg0, %c0_i32, %c0_i32_0 : i32, i32, i32
  }
  func.func @transform_3(%arg0: i32) -> (i32, i32) {
    %c0_i32 = arith.constant 0 : i32
    %c0_i32_0 = arith.constant 0 : i32
    %c0_i32_1 = arith.constant 0 : i32
    return %c0_i32, %c0_i32_0 : i32, i32
  }
  func.func @transform_4(%arg0: i32) -> (i32, i32) {
    %c0_i32 = arith.constant 0 : i32
    %c0_i32_0 = arith.constant 0 : i32
    %c0_i32_1 = arith.constant 0 : i32
    return %c0_i32, %c0_i32_0 : i32, i32
  }
  func.func @transform_5(%arg0: i32) -> (i32, i32) {
    %c0_i32 = arith.constant 0 : i32
    %c0_i32_0 = arith.constant 0 : i32
    %c0_i32_1 = arith.constant 0 : i32
    return %c0_i32, %c0_i32_0 : i32, i32
  }
}

</mosaic_0001>

<bundles_post_ra>
// kernel: domain_classifier.1
= control target key start
LH: loop header
LB: loop body
LE: loop exit
PB: predicated region body
PF: predicated region fallthrough
CT: control target
= control target key end

     0   :  { %10 = vsyncpa [#allocation4], 0  ;;  %s5070_s0 = inlined_call_operand.vmem [shape: bf16[16,512], index: 0, kind: input, shape index: {}]   ;;  %s5071_s1 = inlined_call_operand.hbm [shape: bf16[4,512,512], index: 1, kind: input, shape index: {}]   ;;  %s5072_s2 = inlined_call_operand.hbm [shape: f32[4,2,512], index: 2, kind: input, shape index: {}]   ;;  %s5073_s3 = inlined_call_operand.hbm [shape: bf16[512,128], index: 3, kind: input, shape index: {}]   ;;  %s5074_s4 = inlined_call_operand.hbm [shape: f32[1,128], index: 4, kind: input, shape index: {}]   ;;  %s5075_s5 = inlined_call_operand.vmem [shape: bf16[16,128], index: 5, kind: output, shape index: {}]  }
   0x1   :  { %12 = vsyncpa [#allocation4 + $0x1], 0 }
   0x2   :  { %13 = vsyncpa [#allocation6], 0 }
   0x3   :  { %15 = vsyncpa [#allocation6 + $0x1], 0 }
   0x4   :  { %16 = vsyncpa [#allocation9], 0  ;;  %s4375_s18 = smov 0   ;;  %s4377_s19 = smov 0  }
   0x5   :  { %s4379_s20 = smov 0   ;;  %s4381_s21 = smov 0  }
   0x6 LB: > { %s4394_s22 = sadd.s32 4294967295, %s4331_s21   ;;  %p63_p0 = scmp.ne.s32.totalorder %s4323_s19, %s4319_s18  ;;  %s4331_s21 = sphi %s4381_s21, %s5093_s21   ;;  %s4327_s20 = sphi %s4379_s20, %s5092_s20   ;;  %s4323_s19 = sphi %s4377_s19, %s5091_s19   ;;  %s4319_s18 = sphi %s4375_s18, %s5090_s18  }
   0x7   : > { %p5076_p1 = scmp.eq.s32.totalorder %s4394_s22, 0  ;;  %p3142_p2 = scmp.ge.s32.totalorder %s4331_s21, 1 }
   0x8   : > { %p163_p3 = scmp.lt.s32.totalorder %s4331_s21, 3  ;;  %s4333_s25 = smov [#allocation7]  }
   0x9   : > { %p4403_p5 = por %p5076_p1, %p63_p0  ;;  %s178_s26 = sshll.u32 %s4333_s25, 4  ;;  %s179_s26 = int_to_ptr.vmem [resolvable:$true] %s178_s26 }
   0xa   : > { %p4407_p6 = pnand %p3142_p2, %p163_p3  ;;  %s4334_s28 = smov [#allocation8]  }
   0xb   : > { %s5079_s23 = scalar_select %p4403_p5, 1, 0 }
   0xc   : > { %s5080_s24 = scalar_select %p4407_p6, 1, 0 }
   0xd   : > { %p3670_p7 = pneg %p4407_p6  ;;  %s192_s29 = sshll.u32 %s4334_s28, 4  ;;  %s4419_s29 = int_to_ptr.vmem [resolvable:$true] %s192_s29 }
   0xe   : > { %s4169_s7 = scalar_lea.hbm %s5073_s3, 4096 }
   0xf   : > { %p4415_p8 = pnand %p3670_p7, %p5076_p1  ;;  %p4170_p9 = scmp.ne.s32.totalorder %s5073_s3, %s4169_s7 }
  0x10   : > { %p4176_p13 = scmp.lt.u32.totalorder %s4169_s7, %s5073_s3 }
  0x11   : > { %p4171_p10 = pneg %p4415_p8 }
  0x13   : > { %p4172_p11 = pnand %p4171_p10, %p4170_p9 }
  0x15   : > { %p4173_p12 = pneg %p4172_p11 }
  0x17   : > { %p4178_p0 = pnand %p4176_p13, %p4173_p12 }
  0x19   : > { %4181 = shalt.err (!%p4178_p0)
}
  0x1a   : > { %s4182_s12 = scalar_lea.vmem %s179_s26, 4096  ;;  %p4190_p4 = scmp.lt.s32.totalorder %s179_s26, %s179_s26 }
  0x1b   : > { %p4183_p2 = scmp.ne.s32.totalorder %s179_s26, %s4182_s12  ;;  %p4191_p1 = scmp.lt.s32.totalorder %s4182_s12, %s4182_s12 }
  0x1d   : > { %p4185_p3 = pnand %p4183_p2, %p4171_p10  ;;  %p4192_p5 = por %p4191_p1, %p4190_p4 }
  0x1f   : > { %p4186_p7 = pneg %p4185_p3 }
  0x21   : > { %p4193_p6 = pnand %p4192_p5, %p4186_p7 }
  0x23   : > { %4196 = shalt.err (!%p4193_p6)
}
  0x24   : > { %s4335_s13 = smov 64   ;;  %s4336_s14 = smov 4  }
  0x25   : > { %3673 = dma.hbm_to_vmem [thread:$0]  (!%p4415_p8), %s5073_s3, 4096, %s179_s26, [#allocation6], %s4335_s13, %s4335_s13, %s4336_s14  }
  0x26   : > { %s4197_s25 = scalar_lea.hbm %s5074_s4, 16 }
  0x27   : > { %p4198_p9 = scmp.ne.s32.totalorder %s5074_s4, %s4197_s25  ;;  %p4204_p5 = scmp.lt.u32.totalorder %s4197_s25, %s5074_s4 }
  0x29   : > { %p4200_p1 = pnand %p4198_p9, %p4171_p10 }
  0x2b   : > { %p4201_p4 = pneg %p4200_p1 }
  0x2d   : > { %p4206_p6 = pnand %p4204_p5, %p4201_p4 }
  0x2f   : > { %4209 = shalt.err (!%p4206_p6)
}
  0x30   : > { %s4210_s26 = scalar_lea.vmem %s4419_s29, 16  ;;  %s4217_s8 = scalar_lea.vmem %s4419_s29, 32 }
  0x31   : > { %p4211_p11 = scmp.ne.s32.totalorder %s4419_s29, %s4210_s26  ;;  %p4218_p0 = scmp.lt.s32.totalorder %s4419_s29, %s4419_s29 }
  0x32   : > { %p4219_p2 = scmp.lt.s32.totalorder %s4217_s8, %s4210_s26 }
  0x33   : > { %p4213_p12 = pnand %p4211_p11, %p4171_p10 }
  0x34   : > { %p4220_p3 = por %p4219_p2, %p4218_p0 }
  0x35   : > { %p4214_p13 = pneg %p4213_p12 }
  0x37   : > { %p4221_p7 = pnand %p4220_p3, %p4214_p13 }
  0x39   : > { %4224 = shalt.err (!%p4221_p7)
}
  0x3a   : > { %3676 = dma.hbm_to_vmem [thread:$0]  (!%p4415_p8), %s5074_s4, 16, %s4419_s29, [#allocation9]  }
  0x3b   : > { %s4470_s11 = sadd.s32 1, %s4331_s21   ;;  %s50_s12 = sadd.s32 1, %s4327_s20 }
  0x3c   : > { %s47_s27 = ssub.s32 %s4331_s21, %s4470_s11  ;;  %p57_p10 = scmp.ne.s32.totalorder %s4327_s20, %s4323_s19 }
  0x3d   : > { %p48_p9 = scmp.eq.s32.totalorder %s47_s27, 0  ;;  %p58_p1 = scmp.eq.s32.totalorder %s4331_s21, 0 }
  0x3e   : > { %p3686_p4 = scmp.lt.s32.totalorder %s4331_s21, 2  ;;  %s4480_s13 = sand.u32 1, %s4327_s20  }
  0x3f   : > { %s4483_s14 = scalar_select %p48_p9, %s4327_s20, %s50_s12  }
  0x40   : > { %p59_p5 = por %p58_p1, %p57_p10  ;;  %s3146_s15 = sshll.u32 %s4480_s13, 11 }
  0x41   : > { %s3588_s16 = sshll.u32 %s4331_s21, 15  ;;  %s207_s25 = scalar_lea.vmem [#allocation3], %s3146_s15 }
  0x42   : > { %s4490_s18 = scalar_lea.hbm %s5071_s1, %s3588_s16  ;;  %s215_s28 = sshll.u32 %s207_s25, 4  ;;  %s4496_s28 = int_to_ptr.vmem [resolvable:$true] %s215_s28 }
  0x43   : > { %p4492_p8 = pnand %p3686_p4, %p59_p5  ;;  %s204_s6 = scalar_lea.sflag [#allocation4], %s4480_s13 }
  0x44   : > { %s4225_s7 = scalar_lea.hbm %s4490_s18, 32768  ;;  %s4230_s9 = scalar_lea.hbm %s5071_s1, 65536 }
  0x45   : > { %p4226_p6 = scmp.ne.s32.totalorder %s4490_s18, %s4225_s7  ;;  %p4227_p11 = pneg %p4492_p8 }
  0x46   : > { %p4231_p0 = scmp.lt.u32.totalorder %s4490_s18, %s5071_s1  ;;  %p4232_p2 = scmp.lt.u32.totalorder %s4230_s9, %s4225_s7 }
  0x47   : > { %p4228_p12 = pnand %p4227_p11, %p4226_p6  ;;  %p4234_p7 = scmp.lt.u32.totalorder %s4225_s7, %s4490_s18 }
  0x48   : > { %p4233_p3 = por %p4232_p2, %p4231_p0 }
  0x49   : > { %p4229_p13 = pneg %p4228_p12 }
  0x4a   : > { %p4235_p10 = por %p4234_p7, %p4233_p3 }
  0x4c   : > { %p4236_p9 = pnand %p4235_p10, %p4229_p13 }
  0x4e   : > { %4239 = shalt.err (!%p4236_p9)
}
  0x4f   : > { %s4240_s27 = scalar_lea.vmem %s4496_s28, 32768  ;;  %s4337_s15 = smov [#allocation3]  }
  0x50   : > { %p4241_p1 = scmp.ne.s32.totalorder %s4496_s28, %s4240_s27  ;;  %s4245_s16 = sshll.u32 %s4337_s15, 4  ;;  %s4246_s16 = int_to_ptr.vmem [resolvable:$false] %s4245_s16 }
  0x51   : > { %s4247_s17 = scalar_lea.vmem %s4246_s16, 65536  ;;  %p4248_p6 = scmp.lt.s32.totalorder %s4496_s28, %s4246_s16 }
  0x52   : > { %p4243_p4 = pnand %p4241_p1, %p4227_p11  ;;  %p4249_p12 = scmp.lt.s32.totalorder %s4247_s17, %s4240_s27 }
  0x54   : > { %p4244_p5 = pneg %p4243_p4  ;;  %p4250_p0 = por %p4249_p12, %p4248_p6 }
  0x56   : > { %p4251_p2 = pnand %p4250_p0, %p4244_p5 }
  0x58   : > { %4254 = shalt.err (!%p4251_p2)
}
  0x59   : > { %s4338_s29 = smov 256   ;;  %s4339_s25 = smov 16  }
  0x5a   : > { %3680 = dma.hbm_to_vmem [thread:$0]  (!%p4492_p8), %s4490_s18, 32768, %s4496_s28, %s204_s6, %s4338_s29, %s4338_s29, %s4339_s25  }
  0x5b   : > { %s225_s7 = sand.u32 1, %s4331_s21   ;;  %s3150_s26 = sshll.u32 %s4480_s13, 4 }
  0x5c   : > { %s3590_s8 = sshll.u32 %s4331_s21, 8  ;;  %s229_s9 = scalar_lea.vmem [#allocation5], %s3150_s26 }
  0x5d   : > { %s237_s10 = sshll.u32 %s229_s9, 4  ;;  %s4532_s15 = scalar_lea.hbm %s5072_s2, %s3590_s8  ;;  %s4534_s10 = int_to_ptr.vmem [resolvable:$true] %s237_s10 }
  0x5e   : > { %s4536_s16 = scalar_lea.sflag [#allocation6], %s225_s7  ;;  %s4255_s17 = scalar_lea.hbm %s4532_s15, 256 }
  0x5f   : > { %p4256_p13 = scmp.ne.s32.totalorder %s4532_s15, %s4255_s17  ;;  %s4260_s18 = scalar_lea.hbm %s5072_s2, 512 }
  0x60   : > { %p4261_p10 = scmp.lt.u32.totalorder %s4532_s15, %s5072_s2  ;;  %p4262_p9 = scmp.lt.u32.totalorder %s4260_s18, %s4255_s17 }
  0x61   : > { %p4258_p3 = pnand %p4256_p13, %p4227_p11  ;;  %p4264_p4 = scmp.lt.u32.totalorder %s4255_s17, %s4532_s15 }
  0x62   : > { %p4263_p1 = por %p4262_p9, %p4261_p10 }
  0x63   : > { %p4259_p7 = pneg %p4258_p3 }
  0x64   : > { %p4265_p5 = por %p4264_p4, %p4263_p1 }
  0x66   : > { %p4266_p6 = pnand %p4265_p5, %p4259_p7 }
  0x68   : > { %4269 = shalt.err (!%p4266_p6)
}
  0x69   : > { %s4270_s29 = scalar_lea.vmem %s4534_s10, 256  ;;  %s4340_s25 = smov [#allocation5]  }
  0x6a   : > { %p4271_p12 = scmp.ne.s32.totalorder %s4534_s10, %s4270_s29  ;;  %s4275_s7 = sshll.u32 %s4340_s25, 4  ;;  %s4276_s7 = int_to_ptr.vmem [resolvable:$false] %s4275_s7 }
  0x6b   : > { %s4277_s26 = scalar_lea.vmem %s4276_s7, 512  ;;  %p4278_p13 = scmp.lt.s32.totalorder %s4534_s10, %s4276_s7 }
  0x6c   : > { %p4273_p0 = pnand %p4271_p12, %p4227_p11  ;;  %p4279_p3 = scmp.lt.s32.totalorder %s4277_s26, %s4270_s29 }
  0x6e   : > { %p4274_p2 = pneg %p4273_p0  ;;  %p4280_p10 = por %p4279_p3, %p4278_p13 }
  0x70   : > { %p4281_p9 = pnand %p4280_p10, %p4274_p2 }
  0x72   : > { %4284 = shalt.err (!%p4281_p9)
}
  0x73   : > { %s4341_s8 = smov 128   ;;  %s4342_s9 = smov 8  }
  0x74   : > { %3683 = dma.hbm_to_vmem [thread:$0]  (!%p4492_p8), %s4532_s15, 256, %s4534_s10, %s4536_s16, %s4341_s8, %s4341_s8, %s4342_s9  }
  0x75   : > { %p5083_p11 = scmp.ne.s32.totalorder %s5080_s24, 0 }
  0x76   : > { %s251_s12 = sand.u32 (!%p5083_p11), 1, %s4323_s19   ;;  %p5084_p7 = scmp.ne.s32.totalorder (!%p5083_p11), %s5079_s23, 0 }
  0x77   : > { %249 = sbr.rel (%p5083_p11) target bundleno = 1166 (0x48e), region = 40  ;;  %s3155_s27 = sshll.u32 (!%p5083_p11), %s251_s12, 11 }
  0x78   : > { %s252_s17 = scalar_lea.sflag (!%p5083_p11), [#allocation4], %s251_s12  ;;  %s4565_s21 = scalar_lea.vmem (!%p5083_p11), [#allocation3], %s3155_s27 }
  0x7e   : > { %4302 = dma.done.wait (%p5084_p7), %s252_s17, 32768  }
  0x7f   : > { %4304 = vsyncadd (%p5084_p7), %s252_s17, 4294934528  ;;  %s260_s13 = sand.u32 1, %s4394_s22   ;;  %s3156_s30 = sshll.u32 %s251_s12, 4 }
  0x80   : > { %s261_s10 = scalar_lea.sflag [#allocation6], %s260_s13  ;;  %s4572_s15 = scalar_lea.vmem [#allocation5], %s3156_s30 }
  0x81   : > { %4306 = dma.done.wait (%p5084_p7), %s261_s10, 256  }
  0x82   : > { %4308 = vsyncadd (%p5084_p7), %s261_s10, 4294967040  ;;  %p5085_p8 = scmp.eq.s32.totalorder %s4394_s22, 0 }
  0x84   : > { %4310 = dma.done.wait (%p5085_p8), [#allocation6], 4096   ;;  %p5086_p1 = pmov %p5085_p8 }
  0x86   : > { %4312 = vsyncadd (%p5086_p1), [#allocation6], 4294963200  ;;  %p5087_p4 = pmov %p5086_p1 }
  0x87   : > { %p5088_p5 = pmov %p5086_p1 }
  0x88   : > { %4314 = dma.done.wait (%p5087_p4), [#allocation9], 16  }
  0x89   : > { %4316 = vsyncadd (%p5088_p5), [#allocation9], 4294967280  ;;  %p5089_p6 = scmp.ne.s32.totalorder %s4394_s22, 0 }
  0x8a   : > { %v3731_v0 = vld [vmem:[%s5070_s0] ss:$16 sps:$4 sm:$0xff] (!%p5089_p6)   ;;  %v3733_v1 = vld [vmem:[%s5070_s0 + $0x4] ss:$16 sps:$4 sm:$0xff] (!%p5089_p6)   ;;  %v3734_v2 = vld [vmem:[%s5070_s0 + $0x8] ss:$16 sps:$4 sm:$0xff] (!%p5089_p6)  }
  0x8b   : > { %305 = sbr.rel (%p5089_p6) target bundleno = 146 (0x92), region = 60  ;;  %330 = vst [vmem:[#allocation2] sm:$0xff] (!%p5089_p6), %v3731_v0  ;;  %v3736_v3 = vld [vmem:[%s5070_s0 + $0xc] ss:$16 sps:$4 sm:$0xff] (!%p5089_p6)   ;;  %331 = vst [vmem:[#allocation2 + $0x8] sm:$0xff] (!%p5089_p6), %v3733_v1 }
  0x8c   : > { %332 = vst [vmem:[#allocation2 + $0x10] sm:$0xff] (!%p5089_p6), %v3734_v2  ;;  %333 = vst [vmem:[#allocation2 + $0x18] sm:$0xff] (!%p5089_p6), %v3736_v3 }
  0x92 PF: > { %v3737_v4 = vld [vmem:[%s4565_s21 + $0x4] ss:$16 sps:$4 sm:$0xff]   ;;  %v3739_v5 = vld [vmem:[%s4565_s21 + $0xc] ss:$16 sps:$4 sm:$0xff]   ;;  %v3741_v6 = vld [vmem:[%s4565_s21] ss:$16 sps:$4 sm:$0xff]  }
  0x93   : > { %1106 = vmatprep.subr.bf16.mxu0 %v3737_v4  ;;  %v3742_v7 = vld [vmem:[%s4565_s21 + $0x8] ss:$16 sps:$4 sm:$0xff]   ;;  %1192 = vmatprep.subr.bf16.mxu1 %v3739_v5  ;;  %v3743_v8 = vld [vmem:[%s4565_s21 + $0x24] ss:$16 sps:$4 sm:$0xff]   ;;  %v3745_v9 = vld [vmem:[%s4565_s21 + $0x2c] ss:$16 sps:$4 sm:$0xff]  }
  0x94   : > { %1107 = vmatpush1.bf16.msra.mxu0 %v3741_v6  ;;  %1193 = vmatpush1.bf16.msra.mxu1 %v3742_v7  ;;  %v3747_v10 = vld [vmem:[%s4565_s21 + $0x20] ss:$16 sps:$4 sm:$0xff]   ;;  %v3748_v11 = vld [vmem:[%s4565_s21 + $0x28] ss:$16 sps:$4 sm:$0xff]   ;;  %v3749_v12 = vld [vmem:[%s4565_s21 + $0x44] ss:$16 sps:$4 sm:$0xff]  }
  0x95   : > { %1108 = vmatprep.subr.bf16.mxu0 %v3743_v8  ;;  %1194 = vmatprep.subr.bf16.mxu1 %v3745_v9  ;;  %v3751_v13 = vld [vmem:[%s4565_s21 + $0x4c] ss:$16 sps:$4 sm:$0xff]   ;;  %v3753_v14 = vld [vmem:[%s4565_s21 + $0x40] ss:$16 sps:$4 sm:$0xff]   ;;  %v3754_v15 = vld [vmem:[%s4565_s21 + $0x48] ss:$16 sps:$4 sm:$0xff]  }
  0x96   : > { %v3755_v16 = vld [vmem:[%s4565_s21 + $0x64] ss:$16 sps:$4 sm:$0xff]   ;;  %v3757_v17 = vld [vmem:[%s4565_s21 + $0x6c] ss:$16 sps:$4 sm:$0xff]   ;;  %v3759_v18 = vld [vmem:[%s4565_s21 + $0x60] ss:$16 sps:$4 sm:$0xff]  }
  0x97   : > { %v3760_v19 = vld [vmem:[%s4565_s21 + $0x68] ss:$16 sps:$4 sm:$0xff]   ;;  %v3761_v20 = vld [vmem:[%s4565_s21 + $0x84] ss:$16 sps:$4 sm:$0xff]   ;;  %v3763_v21 = vld [vmem:[%s4565_s21 + $0x8c] ss:$16 sps:$4 sm:$0xff]  }
  0x98   : > { %1109 = vmatpush1.bf16.msra.mxu0 %v3747_v10  ;;  %1195 = vmatpush1.bf16.msra.mxu1 %v3748_v11  ;;  %v3765_v22 = vld [vmem:[%s4565_s21 + $0x80] ss:$16 sps:$4 sm:$0xff]   ;;  %v3766_v23 = vld [vmem:[%s4565_s21 + $0x88] ss:$16 sps:$4 sm:$0xff]   ;;  %v3767_v24 = vld [vmem:[%s4565_s21 + $0xa4] ss:$16 sps:$4 sm:$0xff]  }
  0x99   : > { %1110 = vmatprep.subr.bf16.mxu0 %v3749_v12  ;;  %1196 = vmatprep.subr.bf16.mxu1 %v3751_v13  ;;  %v3769_v25 = vld [vmem:[%s4565_s21 + $0xac] ss:$16 sps:$4 sm:$0xff]   ;;  %v3771_v26 = vld [vmem:[%s4565_s21 + $0xa0] ss:$16 sps:$4 sm:$0xff]   ;;  %v3772_v27 = vld [vmem:[%s4565_s21 + $0xa8] ss:$16 sps:$4 sm:$0xff]  }
  0x9a   : > { %v3773_v28 = vld [vmem:[%s4565_s21 + $0xc4] ss:$16 sps:$4 sm:$0xff]   ;;  %v3775_v29 = vld [vmem:[%s4565_s21 + $0xcc] ss:$16 sps:$4 sm:$0xff]   ;;  %v3777_v30 = vld [vmem:[%s4565_s21 + $0xc0] ss:$16 sps:$4 sm:$0xff]  }
  0x9b   : > { %v3778_v31 = vld [vmem:[%s4565_s21 + $0xc8] ss:$16 sps:$4 sm:$0xff]   ;;  %v3779_v32 = vld [vmem:[%s4565_s21 + $0xe4] ss:$16 sps:$4 sm:$0xff]   ;;  %v3781_v33 = vld [vmem:[%s4565_s21 + $0xec] ss:$16 sps:$4 sm:$0xff]  }
  0x9c   : > { %1111 = vmatpush1.bf16.msra.mxu0 %v3753_v14  ;;  %1197 = vmatpush1.bf16.msra.mxu1 %v3754_v15  ;;  %v3783_v34 = vld [vmem:[%s4565_s21 + $0xe0] ss:$16 sps:$4 sm:$0xff]   ;;  %v3784_v35 = vld [vmem:[%s4565_s21 + $0xe8] ss:$16 sps:$4 sm:$0xff]   ;;  %v3785_v36 = vld [vmem:[%s4565_s21 + $0x104] ss:$16 sps:$4 sm:$0xff]  }
  0x9d   : > { %1112 = vmatprep.subr.bf16.mxu0 %v3755_v16  ;;  %1198 = vmatprep.subr.bf16.mxu1 %v3757_v17  ;;  %v3787_v37 = vld [vmem:[%s4565_s21 + $0x10c] ss:$16 sps:$4 sm:$0xff]   ;;  %v3789_v38 = vld [vmem:[%s4565_s21 + $0x100] ss:$16 sps:$4 sm:$0xff]   ;;  %v3790_v39 = vld [vmem:[%s4565_s21 + $0x108] ss:$16 sps:$4 sm:$0xff]  }
  0x9e   : > { %v3791_v40 = vld [vmem:[%s4565_s21 + $0x124] ss:$16 sps:$4 sm:$0xff]   ;;  %v3793_v41 = vld [vmem:[%s4565_s21 + $0x12c] ss:$16 sps:$4 sm:$0xff]   ;;  %v3795_v42 = vld [vmem:[%s4565_s21 + $0x120] ss:$16 sps:$4 sm:$0xff]  }
  0x9f   : > { %v3796_v43 = vld [vmem:[%s4565_s21 + $0x128] ss:$16 sps:$4 sm:$0xff]   ;;  %v3797_v44 = vld [vmem:[%s4565_s21 + $0x144] ss:$16 sps:$4 sm:$0xff]   ;;  %v3799_v45 = vld [vmem:[%s4565_s21 + $0x14c] ss:$16 sps:$4 sm:$0xff]  }
  0xa0   : > { %1113 = vmatpush1.bf16.msra.mxu0 %v3759_v18  ;;  %1199 = vmatpush1.bf16.msra.mxu1 %v3760_v19  ;;  %v3801_v46 = vld [vmem:[%s4565_s21 + $0x140] ss:$16 sps:$4 sm:$0xff]   ;;  %v3802_v47 = vld [vmem:[%s4565_s21 + $0x148] ss:$16 sps:$4 sm:$0xff]   ;;  %v3803_v48 = vld [vmem:[%s4565_s21 + $0x164] ss:$16 sps:$4 sm:$0xff]  }
  0xa1   : > { %1114 = vmatprep.subr.bf16.mxu0 %v3761_v20  ;;  %1200 = vmatprep.subr.bf16.mxu1 %v3763_v21  ;;  %v3805_v49 = vld [vmem:[%s4565_s21 + $0x16c] ss:$16 sps:$4 sm:$0xff]   ;;  %v3807_v51 = vld [vmem:[%s4565_s21 + $0x160] ss:$16 sps:$4 sm:$0xff]   ;;  %v3808_v52 = vld [vmem:[%s4565_s21 + $0x168] ss:$16 sps:$4 sm:$0xff]  }
  0xa2   : > { %v335_v50 = vld [vmem:[#allocation2 + $0x8] sm:$0xff]  ;;  %v3809_v53 = vld [vmem:[%s4565_s21 + $0x184] ss:$16 sps:$4 sm:$0xff]   ;;  %v3813_v55 = vld [vmem:[%s4565_s21 + $0x180] ss:$16 sps:$4 sm:$0xff]   ;;  %p3549_p12 = scmp.ne.s32.totalorder %s4394_s22, 1 }
  0xa3   : > { %1138 = vmatprep.mubr.bf16.mxu0 %v335_v50  ;;  %1224 = vmatprep.mubr.bf16.mxu1 %v335_v50  ;;  %v3811_v54 = vld [vmem:[%s4565_s21 + $0x18c] ss:$16 sps:$4 sm:$0xff]   ;;  %v3814_v56 = vld [vmem:[%s4565_s21 + $0x188] ss:$16 sps:$4 sm:$0xff]   ;;  %v3815_v57 = vld [vmem:[%s4565_s21 + $0x1a4] ss:$16 sps:$4 sm:$0xff]  }
  0xa4   : > { %1115 = vmatpush1.bf16.msra.mxu0 %v3765_v22  ;;  %1201 = vmatpush1.bf16.msra.mxu1 %v3766_v23  ;;  %v3817_v58 = vld [vmem:[%s4565_s21 + $0x1ac] ss:$16 sps:$4 sm:$0xff]   ;;  %v3819_v59 = vld [vmem:[%s4565_s21 + $0x1a0] ss:$16 sps:$4 sm:$0xff]   ;;  %v3820_v60 = vld [vmem:[%s4565_s21 + $0x1a8] ss:$16 sps:$4 sm:$0xff]  }
  0xa5   : > { %1116 = vmatprep.subr.bf16.mxu0 %v3767_v24  ;;  %1202 = vmatprep.subr.bf16.mxu1 %v3769_v25  ;;  %v3821_v61 = vld [vmem:[%s4565_s21 + $0x1c4] ss:$16 sps:$4 sm:$0xff]   ;;  %v3823_v62 = vld [vmem:[%s4565_s21 + $0x1cc] ss:$16 sps:$4 sm:$0xff]   ;;  %v3825_v63 = vld [vmem:[%s4565_s21 + $0x1c0] ss:$16 sps:$4 sm:$0xff]  }
  0xa6   : > { %v3826_v0 = vld [vmem:[%s4565_s21 + $0x1c8] ss:$16 sps:$4 sm:$0xff]   ;;  %v3827_v1 = vld [vmem:[%s4565_s21 + $0x1e4] ss:$16 sps:$4 sm:$0xff]   ;;  %v3829_v2 = vld [vmem:[%s4565_s21 + $0x1ec] ss:$16 sps:$4 sm:$0xff]  }
  0xa7   : > { %v3831_v3 = vld [vmem:[%s4565_s21 + $0x1e0] ss:$16 sps:$4 sm:$0xff]   ;;  %v3832_v4 = vld [vmem:[%s4565_s21 + $0x1e8] ss:$16 sps:$4 sm:$0xff]   ;;  %v3835_v5 = vld [vmem:[%s4565_s21 + $0x204] ss:$16 sps:$4 sm:$0xff]  }
  0xa8   : > { %1117 = vmatpush1.bf16.msra.mxu0 %v3771_v26  ;;  %1203 = vmatpush1.bf16.msra.mxu1 %v3772_v27  ;;  %v3838_v6 = vld [vmem:[%s4565_s21 + $0x20c] ss:$16 sps:$4 sm:$0xff]   ;;  %v3833_v7 = vld [vmem:[%s4565_s21 + $0x200] ss:$16 sps:$4 sm:$0xff]   ;;  %v3836_v8 = vld [vmem:[%s4565_s21 + $0x208] ss:$16 sps:$4 sm:$0xff]  }
  0xa9   : > { %1118 = vmatprep.subr.bf16.mxu0 %v3773_v28  ;;  %1204 = vmatprep.subr.bf16.mxu1 %v3775_v29  ;;  %v334_v9 = vld [vmem:[#allocation2] sm:$0xff]  ;;  %v3844_v11 = vld [vmem:[%s4565_s21 + $0x22c] ss:$16 sps:$4 sm:$0xff]   ;;  %v3842_v13 = vld [vmem:[%s4565_s21 + $0x228] ss:$16 sps:$4 sm:$0xff]  }
  0xaa   : > { %v3841_v10 = vld [vmem:[%s4565_s21 + $0x224] ss:$16 sps:$4 sm:$0xff]   ;;  %v3839_v12 = vld [vmem:[%s4565_s21 + $0x220] ss:$16 sps:$4 sm:$0xff]   ;;  %v3850_v15 = vld [vmem:[%s4565_s21 + $0x24c] ss:$16 sps:$4 sm:$0xff]  }
  0xab   : > { %v3847_v14 = vld [vmem:[%s4565_s21 + $0x244] ss:$16 sps:$4 sm:$0xff]   ;;  %v3845_v16 = vld [vmem:[%s4565_s21 + $0x240] ss:$16 sps:$4 sm:$0xff]   ;;  %v3848_v17 = vld [vmem:[%s4565_s21 + $0x248] ss:$16 sps:$4 sm:$0xff]  }
  0xac   : > { %1119 = vmatpush1.bf16.msra.mxu0 %v3777_v30  ;;  %1205 = vmatpush1.bf16.msra.mxu1 %v3778_v31  ;;  %v3853_v18 = vld [vmem:[%s4565_s21 + $0x264] ss:$16 sps:$4 sm:$0xff]   ;;  %v3856_v19 = vld [vmem:[%s4565_s21 + $0x26c] ss:$16 sps:$4 sm:$0xff]   ;;  %v3851_v20 = vld [vmem:[%s4565_s21 + $0x260] ss:$16 sps:$4 sm:$0xff]  }
  0xad   : > { %1120 = vmatprep.subr.bf16.mxu0 %v3779_v32  ;;  %1206 = vmatprep.subr.bf16.mxu1 %v3781_v33  ;;  %v3854_v21 = vld [vmem:[%s4565_s21 + $0x268] ss:$16 sps:$4 sm:$0xff]   ;;  %v3859_v22 = vld [vmem:[%s4565_s21 + $0x284] ss:$16 sps:$4 sm:$0xff]   ;;  %v3862_v23 = vld [vmem:[%s4565_s21 + $0x28c] ss:$16 sps:$4 sm:$0xff]  }
  0xae   : > { %v3857_v24 = vld [vmem:[%s4565_s21 + $0x280] ss:$16 sps:$4 sm:$0xff]   ;;  %v3860_v25 = vld [vmem:[%s4565_s21 + $0x288] ss:$16 sps:$4 sm:$0xff]   ;;  %v3865_v26 = vld [vmem:[%s4565_s21 + $0x2a4] ss:$16 sps:$4 sm:$0xff]  }
  0xaf   : > { %v3868_v27 = vld [vmem:[%s4565_s21 + $0x2ac] ss:$16 sps:$4 sm:$0xff]   ;;  %v3863_v28 = vld [vmem:[%s4565_s21 + $0x2a0] ss:$16 sps:$4 sm:$0xff]   ;;  %v3866_v29 = vld [vmem:[%s4565_s21 + $0x2a8] ss:$16 sps:$4 sm:$0xff]  }
  0xb0   : > { %1121 = vmatpush1.bf16.msra.mxu0 %v3783_v34  ;;  %1207 = vmatpush1.bf16.msra.mxu1 %v3784_v35  ;;  %v3871_v30 = vld [vmem:[%s4565_s21 + $0x2c4] ss:$16 sps:$4 sm:$0xff]   ;;  %v3874_v31 = vld [vmem:[%s4565_s21 + $0x2cc] ss:$16 sps:$4 sm:$0xff]   ;;  %v3869_v32 = vld [vmem:[%s4565_s21 + $0x2c0] ss:$16 sps:$4 sm:$0xff]  }
  0xb1   : > { %1122 = vmatprep.subr.bf16.mxu0 %v3785_v36  ;;  %1208 = vmatprep.subr.bf16.mxu1 %v3787_v37  ;;  %v3872_v33 = vld [vmem:[%s4565_s21 + $0x2c8] ss:$16 sps:$4 sm:$0xff]   ;;  %v3877_v35 = vld [vmem:[%s4565_s21 + $0x2e4] ss:$16 sps:$4 sm:$0xff]   ;;  %v3880_v36 = vld [vmem:[%s4565_s21 + $0x2ec] ss:$16 sps:$4 sm:$0xff]  }
  0xb2   : > { %v337_v34 = vld [vmem:[#allocation2 + $0x18] sm:$0xff]  ;;  %v3875_v37 = vld [vmem:[%s4565_s21 + $0x2e0] ss:$16 sps:$4 sm:$0xff]  }
  0xb3   : > { %v3896_v50 = vld [vmem:[%s4565_s21 + $0x348] ss:$16 sps:$4 sm:$0xff]  }
  0xb4   : > { %1123 = vmatpush1.bf16.msra.mxu0 %v3789_v38  ;;  %1209 = vmatpush1.bf16.msra.mxu1 %v3790_v39  ;;  %v3878_v38 = vld [vmem:[%s4565_s21 + $0x2e8] ss:$16 sps:$4 sm:$0xff]   ;;  %v3883_v39 = vld [vmem:[%s4565_s21 + $0x304] ss:$16 sps:$4 sm:$0xff]  }
  0xb5   : > { %1124 = vmatprep.subr.bf16.mxu0 %v3791_v40  ;;  %1210 = vmatprep.subr.bf16.mxu1 %v3793_v41  ;;  %v3886_v40 = vld [vmem:[%s4565_s21 + $0x30c] ss:$16 sps:$4 sm:$0xff]   ;;  %v3881_v41 = vld [vmem:[%s4565_s21 + $0x300] ss:$16 sps:$4 sm:$0xff]  }
  0xb8   : > { %1125 = vmatpush1.bf16.msra.mxu0 %v3795_v42  ;;  %1211 = vmatpush1.bf16.msra.mxu1 %v3796_v43  ;;  %v3884_v42 = vld [vmem:[%s4565_s21 + $0x308] ss:$16 sps:$4 sm:$0xff]   ;;  %v3889_v43 = vld [vmem:[%s4565_s21 + $0x324] ss:$16 sps:$4 sm:$0xff]  }
  0xb9   : > { %1126 = vmatprep.subr.bf16.mxu0 %v3797_v44  ;;  %1212 = vmatprep.subr.bf16.mxu1 %v3799_v45  ;;  %v3892_v44 = vld [vmem:[%s4565_s21 + $0x32c] ss:$16 sps:$4 sm:$0xff]   ;;  %v3887_v45 = vld [vmem:[%s4565_s21 + $0x320] ss:$16 sps:$4 sm:$0xff]  }
  0xbc   : > { %1127 = vmatpush1.bf16.msra.mxu0 %v3801_v46  ;;  %1213 = vmatpush1.bf16.msra.mxu1 %v3802_v47  ;;  %v3890_v46 = vld [vmem:[%s4565_s21 + $0x328] ss:$16 sps:$4 sm:$0xff]   ;;  %v3895_v47 = vld [vmem:[%s4565_s21 + $0x344] ss:$16 sps:$4 sm:$0xff]  }
  0xbd   : > { %1128 = vmatprep.subr.bf16.mxu0 %v3803_v48  ;;  %1214 = vmatprep.subr.bf16.mxu1 %v3805_v49  ;;  %v3898_v48 = vld [vmem:[%s4565_s21 + $0x34c] ss:$16 sps:$4 sm:$0xff]   ;;  %v3893_v49 = vld [vmem:[%s4565_s21 + $0x340] ss:$16 sps:$4 sm:$0xff]  }
  0xc0   : > { %1129 = vmatpush1.bf16.msra.mxu0 %v3807_v51  ;;  %1215 = vmatpush1.bf16.msra.mxu1 %v3808_v52  ;;  %v3901_v51 = vld [vmem:[%s4565_s21 + $0x364] ss:$16 sps:$4 sm:$0xff]   ;;  %v3904_v52 = vld [vmem:[%s4565_s21 + $0x36c] ss:$16 sps:$4 sm:$0xff]  }
  0xc1   : > { %1130 = vmatprep.subr.bf16.mxu0 %v3809_v53  ;;  %1216 = vmatprep.subr.bf16.mxu1 %v3811_v54  ;;  %v3899_v53 = vld [vmem:[%s4565_s21 + $0x360] ss:$16 sps:$4 sm:$0xff]   ;;  %v3902_v54 = vld [vmem:[%s4565_s21 + $0x368] ss:$16 sps:$4 sm:$0xff]  }
  0xc4   : > { %1131 = vmatpush1.bf16.msra.mxu0 %v3813_v55  ;;  %1217 = vmatpush1.bf16.msra.mxu1 %v3814_v56  ;;  %v3907_v55 = vld [vmem:[%s4565_s21 + $0x384] ss:$16 sps:$4 sm:$0xff]   ;;  %v3910_v56 = vld [vmem:[%s4565_s21 + $0x38c] ss:$16 sps:$4 sm:$0xff]  }
  0xc5   : > { %1132 = vmatprep.subr.bf16.mxu0 %v3815_v57  ;;  %1218 = vmatprep.subr.bf16.mxu1 %v3817_v58  ;;  %v3905_v57 = vld [vmem:[%s4565_s21 + $0x380] ss:$16 sps:$4 sm:$0xff]   ;;  %v3908_v58 = vld [vmem:[%s4565_s21 + $0x388] ss:$16 sps:$4 sm:$0xff]  }
  0xc8   : > { %1133 = vmatpush1.bf16.msra.mxu0 %v3819_v59  ;;  %1219 = vmatpush1.bf16.msra.mxu1 %v3820_v60  ;;  %v3913_v59 = vld [vmem:[%s4565_s21 + $0x3a4] ss:$16 sps:$4 sm:$0xff]   ;;  %v3916_v60 = vld [vmem:[%s4565_s21 + $0x3ac] ss:$16 sps:$4 sm:$0xff]  }
  0xc9   : > { %1134 = vmatprep.subr.bf16.mxu0 %v3821_v61  ;;  %1220 = vmatprep.subr.bf16.mxu1 %v3823_v62  ;;  %v3911_v61 = vld [vmem:[%s4565_s21 + $0x3a0] ss:$16 sps:$4 sm:$0xff]   ;;  %v3914_v62 = vld [vmem:[%s4565_s21 + $0x3a8] ss:$16 sps:$4 sm:$0xff]  }
  0xcc   : > { %1135 = vmatpush1.bf16.msra.mxu0 %v3825_v63  ;;  %1221 = vmatpush1.bf16.msra.mxu1 %v3826_v0  ;;  %v3919_v63 = vld [vmem:[%s4565_s21 + $0x3c4] ss:$16 sps:$4 sm:$0xff]   ;;  %v3922_v0 = vld [vmem:[%s4565_s21 + $0x3cc] ss:$16 sps:$4 sm:$0xff]  }
  0xcd   : > { %1136 = vmatprep.subr.bf16.mxu0 %v3827_v1  ;;  %1222 = vmatprep.subr.bf16.mxu1 %v3829_v2  ;;  %v3917_v1 = vld [vmem:[%s4565_s21 + $0x3c0] ss:$16 sps:$4 sm:$0xff]   ;;  %v3920_v2 = vld [vmem:[%s4565_s21 + $0x3c8] ss:$16 sps:$4 sm:$0xff]  }
  0xd0   : > { %1137 = vmatpush1.bf16.msra.mxu0 %v3831_v3  ;;  %1223 = vmatpush1.bf16.msra.mxu1 %v3832_v4  ;;  %v3925_v3 = vld [vmem:[%s4565_s21 + $0x3e4] ss:$16 sps:$4 sm:$0xff]   ;;  %v3928_v4 = vld [vmem:[%s4565_s21 + $0x3ec] ss:$16 sps:$4 sm:$0xff]  }
  0xd1   : > { %1149 = vmatprep.subr.bf16.mxu0 %v3835_v5  ;;  %1235 = vmatprep.subr.bf16.mxu1 %v3838_v6  ;;  %v3923_v5 = vld [vmem:[%s4565_s21 + $0x3e0] ss:$16 sps:$4 sm:$0xff]   ;;  %v3926_v6 = vld [vmem:[%s4565_s21 + $0x3e8] ss:$16 sps:$4 sm:$0xff]  }
  0xd3   : > { %1139 = vmatmul.mubr.bf16.vlgmr.msra.gmra.mrb[0].mxu0 %v334_v9  ;;  %1225 = vmatmul.mubr.bf16.vlgmr.msra.gmra.mrb[0].mxu1 %v334_v9  ;;  %v3934_v9 = vld [vmem:[%s4565_s21 + $0x40c] ss:$16 sps:$4 sm:$0xff]  }
  0xd4   : > { %1150 = vmatpush1.bf16.msra.mxu0 %v3833_v7  ;;  %1236 = vmatpush1.bf16.msra.mxu1 %v3836_v8  ;;  %v336_v7 = vld [vmem:[#allocation2 + $0x10] sm:$0xff] }
  0xd5   : > { %1151 = vmatprep.subr.bf16.mxu0 %v3841_v10  ;;  %1237 = vmatprep.subr.bf16.mxu1 %v3844_v11  ;;  %v3931_v8 = vld [vmem:[%s4565_s21 + $0x404] ss:$16 sps:$4 sm:$0xff]   ;;  %v3929_v10 = vld [vmem:[%s4565_s21 + $0x400] ss:$16 sps:$4 sm:$0xff]   ;;  %v3932_v11 = vld [vmem:[%s4565_s21 + $0x408] ss:$16 sps:$4 sm:$0xff]  }
  0xd6   : > { %1181 = vmatprep.mubr.bf16.mxu0 %v337_v34  ;;  %1267 = vmatprep.mubr.bf16.mxu1 %v337_v34  ;;  %v3965_v34 = vld [vmem:[%s4565_s21 + $0x4c0] ss:$16 sps:$4 sm:$0xff]  }
  0xd8   : > { %1152 = vmatpush1.bf16.msra.mxu0 %v3839_v12  ;;  %1238 = vmatpush1.bf16.msra.mxu1 %v3842_v13  ;;  %v3937_v12 = vld [vmem:[%s4565_s21 + $0x424] ss:$16 sps:$4 sm:$0xff]   ;;  %v3940_v13 = vld [vmem:[%s4565_s21 + $0x42c] ss:$16 sps:$4 sm:$0xff]  }
  0xd9   : > { %1153 = vmatprep.subr.bf16.mxu0 %v3847_v14  ;;  %1239 = vmatprep.subr.bf16.mxu1 %v3850_v15  ;;  %v3935_v14 = vld [vmem:[%s4565_s21 + $0x420] ss:$16 sps:$4 sm:$0xff]   ;;  %v3938_v15 = vld [vmem:[%s4565_s21 + $0x428] ss:$16 sps:$4 sm:$0xff]  }
  0xdc   : > { %1154 = vmatpush1.bf16.msra.mxu0 %v3845_v16  ;;  %1240 = vmatpush1.bf16.msra.mxu1 %v3848_v17  ;;  %v3943_v16 = vld [vmem:[%s4565_s21 + $0x444] ss:$16 sps:$4 sm:$0xff]   ;;  %v3946_v17 = vld [vmem:[%s4565_s21 + $0x44c] ss:$16 sps:$4 sm:$0xff]  }
  0xdd   : > { %1155 = vmatprep.subr.bf16.mxu0 %v3853_v18  ;;  %1241 = vmatprep.subr.bf16.mxu1 %v3856_v19  ;;  %v3941_v18 = vld [vmem:[%s4565_s21 + $0x440] ss:$16 sps:$4 sm:$0xff]   ;;  %v3944_v19 = vld [vmem:[%s4565_s21 + $0x448] ss:$16 sps:$4 sm:$0xff]  }
  0xe0   : > { %1156 = vmatpush1.bf16.msra.mxu0 %v3851_v20  ;;  %1242 = vmatpush1.bf16.msra.mxu1 %v3854_v21  ;;  %v3949_v20 = vld [vmem:[%s4565_s21 + $0x464] ss:$16 sps:$4 sm:$0xff]   ;;  %v3952_v21 = vld [vmem:[%s4565_s21 + $0x46c] ss:$16 sps:$4 sm:$0xff]  }
  0xe1   : > { %1157 = vmatprep.subr.bf16.mxu0 %v3859_v22  ;;  %1243 = vmatprep.subr.bf16.mxu1 %v3862_v23  ;;  %v3947_v22 = vld [vmem:[%s4565_s21 + $0x460] ss:$16 sps:$4 sm:$0xff]   ;;  %v3950_v23 = vld [vmem:[%s4565_s21 + $0x468] ss:$16 sps:$4 sm:$0xff]  }
  0xe4   : > { %1158 = vmatpush1.bf16.msra.mxu0 %v3857_v24  ;;  %1244 = vmatpush1.bf16.msra.mxu1 %v3860_v25  ;;  %v3955_v24 = vld [vmem:[%s4565_s21 + $0x484] ss:$16 sps:$4 sm:$0xff]   ;;  %v3958_v25 = vld [vmem:[%s4565_s21 + $0x48c] ss:$16 sps:$4 sm:$0xff]  }
  0xe5   : > { %1159 = vmatprep.subr.bf16.mxu0 %v3865_v26  ;;  %1245 = vmatprep.subr.bf16.mxu1 %v3868_v27  ;;  %v3953_v26 = vld [vmem:[%s4565_s21 + $0x480] ss:$16 sps:$4 sm:$0xff]   ;;  %v3956_v27 = vld [vmem:[%s4565_s21 + $0x488] ss:$16 sps:$4 sm:$0xff]  }
  0xe8   : > { %1160 = vmatpush1.bf16.msra.mxu0 %v3863_v28  ;;  %1246 = vmatpush1.bf16.msra.mxu1 %v3866_v29  ;;  %v3961_v28 = vld [vmem:[%s4565_s21 + $0x4a4] ss:$16 sps:$4 sm:$0xff]   ;;  %v3964_v29 = vld [vmem:[%s4565_s21 + $0x4ac] ss:$16 sps:$4 sm:$0xff]  }
  0xe9   : > { %1161 = vmatprep.subr.bf16.mxu0 %v3871_v30  ;;  %1247 = vmatprep.subr.bf16.mxu1 %v3874_v31  ;;  %v3959_v30 = vld [vmem:[%s4565_s21 + $0x4a0] ss:$16 sps:$4 sm:$0xff]   ;;  %v3962_v31 = vld [vmem:[%s4565_s21 + $0x4a8] ss:$16 sps:$4 sm:$0xff]  }
  0xec   : > { %1162 = vmatpush1.bf16.msra.mxu0 %v3869_v32  ;;  %1248 = vmatpush1.bf16.msra.mxu1 %v3872_v33  ;;  %v3967_v32 = vld [vmem:[%s4565_s21 + $0x4c4] ss:$16 sps:$4 sm:$0xff]   ;;  %v3970_v33 = vld [vmem:[%s4565_s21 + $0x4cc] ss:$16 sps:$4 sm:$0xff]  }
  0xed   : > { %1163 = vmatprep.subr.bf16.mxu0 %v3877_v35  ;;  %1249 = vmatprep.subr.bf16.mxu1 %v3880_v36  ;;  %v3968_v35 = vld [vmem:[%s4565_s21 + $0x4c8] ss:$16 sps:$4 sm:$0xff]   ;;  %v3973_v36 = vld [vmem:[%s4565_s21 + $0x4e4] ss:$16 sps:$4 sm:$0xff]  }
  0xf0   : > { %1164 = vmatpush1.bf16.msra.mxu0 %v3875_v37  ;;  %1250 = vmatpush1.bf16.msra.mxu1 %v3878_v38  ;;  %v3976_v37 = vld [vmem:[%s4565_s21 + $0x4ec] ss:$16 sps:$4 sm:$0xff]   ;;  %v3971_v38 = vld [vmem:[%s4565_s21 + $0x4e0] ss:$16 sps:$4 sm:$0xff]  }
  0xf1   : > { %1165 = vmatprep.subr.bf16.mxu0 %v3883_v39  ;;  %1251 = vmatprep.subr.bf16.mxu1 %v3886_v40  ;;  %v3974_v39 = vld [vmem:[%s4565_s21 + $0x4e8] ss:$16 sps:$4 sm:$0xff]   ;;  %v3979_v40 = vld [vmem:[%s4565_s21 + $0x504] ss:$16 sps:$4 sm:$0xff]  }
  0xf4   : > { %1166 = vmatpush1.bf16.msra.mxu0 %v3881_v41  ;;  %1252 = vmatpush1.bf16.msra.mxu1 %v3884_v42  ;;  %v3982_v41 = vld [vmem:[%s4565_s21 + $0x50c] ss:$16 sps:$4 sm:$0xff]   ;;  %v3977_v42 = vld [vmem:[%s4565_s21 + $0x500] ss:$16 sps:$4 sm:$0xff]  }
  0xf5   : > { %1167 = vmatprep.subr.bf16.mxu0 %v3889_v43  ;;  %1253 = vmatprep.subr.bf16.mxu1 %v3892_v44  ;;  %v3980_v43 = vld [vmem:[%s4565_s21 + $0x508] ss:$16 sps:$4 sm:$0xff]   ;;  %v3985_v44 = vld [vmem:[%s4565_s21 + $0x524] ss:$16 sps:$4 sm:$0xff]  }
  0xf8   : > { %1168 = vmatpush1.bf16.msra.mxu0 %v3887_v45  ;;  %1254 = vmatpush1.bf16.msra.mxu1 %v3890_v46  ;;  %v3988_v45 = vld [vmem:[%s4565_s21 + $0x52c] ss:$16 sps:$4 sm:$0xff]   ;;  %v3983_v46 = vld [vmem:[%s4565_s21 + $0x520] ss:$16 sps:$4 sm:$0xff]  }
  0xf9   : > { %1169 = vmatprep.subr.bf16.mxu0 %v3895_v47  ;;  %1255 = vmatprep.subr.bf16.mxu1 %v3898_v48  ;;  %v3986_v47 = vld [vmem:[%s4565_s21 + $0x528] ss:$16 sps:$4 sm:$0xff]   ;;  %v3991_v48 = vld [vmem:[%s4565_s21 + $0x544] ss:$16 sps:$4 sm:$0xff]  }
  0xfc   : > { %1170 = vmatpush1.bf16.msra.mxu0 %v3893_v49  ;;  %1256 = vmatpush1.bf16.msra.mxu1 %v3896_v50  ;;  %v3994_v49 = vld [vmem:[%s4565_s21 + $0x54c] ss:$16 sps:$4 sm:$0xff]   ;;  %v3989_v50 = vld [vmem:[%s4565_s21 + $0x540] ss:$16 sps:$4 sm:$0xff]  }
  0xfd   : > { %1171 = vmatprep.subr.bf16.mxu0 %v3901_v51  ;;  %1257 = vmatprep.subr.bf16.mxu1 %v3904_v52  ;;  %v3992_v51 = vld [vmem:[%s4565_s21 + $0x548] ss:$16 sps:$4 sm:$0xff]   ;;  %v3997_v52 = vld [vmem:[%s4565_s21 + $0x564] ss:$16 sps:$4 sm:$0xff]  }
 0x100   : > { %1172 = vmatpush1.bf16.msra.mxu0 %v3899_v53  ;;  %1258 = vmatpush1.bf16.msra.mxu1 %v3902_v54  ;;  %v4000_v53 = vld [vmem:[%s4565_s21 + $0x56c] ss:$16 sps:$4 sm:$0xff]   ;;  %v3995_v54 = vld [vmem:[%s4565_s21 + $0x560] ss:$16 sps:$4 sm:$0xff]  }
 0x101   : > { %1173 = vmatprep.subr.bf16.mxu0 %v3907_v55  ;;  %1259 = vmatprep.subr.bf16.mxu1 %v3910_v56  ;;  %v3998_v55 = vld [vmem:[%s4565_s21 + $0x568] ss:$16 sps:$4 sm:$0xff]   ;;  %v4003_v56 = vld [vmem:[%s4565_s21 + $0x584] ss:$16 sps:$4 sm:$0xff]  }
 0x104   : > { %1174 = vmatpush1.bf16.msra.mxu0 %v3905_v57  ;;  %1260 = vmatpush1.bf16.msra.mxu1 %v3908_v58  ;;  %v4006_v57 = vld [vmem:[%s4565_s21 + $0x58c] ss:$16 sps:$4 sm:$0xff]   ;;  %v4001_v58 = vld [vmem:[%s4565_s21 + $0x580] ss:$16 sps:$4 sm:$0xff]  }
 0x105   : > { %1175 = vmatprep.subr.bf16.mxu0 %v3913_v59  ;;  %1261 = vmatprep.subr.bf16.mxu1 %v3916_v60  ;;  %v4004_v59 = vld [vmem:[%s4565_s21 + $0x588] ss:$16 sps:$4 sm:$0xff]   ;;  %v4009_v60 = vld [vmem:[%s4565_s21 + $0x5a4] ss:$16 sps:$4 sm:$0xff]  }
 0x108   : > { %1176 = vmatpush1.bf16.msra.mxu0 %v3911_v61  ;;  %1262 = vmatpush1.bf16.msra.mxu1 %v3914_v62  ;;  %v4012_v61 = vld [vmem:[%s4565_s21 + $0x5ac] ss:$16 sps:$4 sm:$0xff]   ;;  %v4007_v62 = vld [vmem:[%s4565_s21 + $0x5a0] ss:$16 sps:$4 sm:$0xff]  }
 0x109   : > { %1177 = vmatprep.subr.bf16.mxu0 %v3919_v63  ;;  %1263 = vmatprep.subr.bf16.mxu1 %v3922_v0  ;;  %v4010_v63 = vld [vmem:[%s4565_s21 + $0x5a8] ss:$16 sps:$4 sm:$0xff]   ;;  %v4015_v0 = vld [vmem:[%s4565_s21 + $0x5c4] ss:$16 sps:$4 sm:$0xff]  }
 0x10c   : > { %1178 = vmatpush1.bf16.msra.mxu0 %v3917_v1  ;;  %1264 = vmatpush1.bf16.msra.mxu1 %v3920_v2  ;;  %v4018_v1 = vld [vmem:[%s4565_s21 + $0x5cc] ss:$16 sps:$4 sm:$0xff]   ;;  %v4013_v2 = vld [vmem:[%s4565_s21 + $0x5c0] ss:$16 sps:$4 sm:$0xff]  }
 0x10d   : > { %1179 = vmatprep.subr.bf16.mxu0 %v3925_v3  ;;  %1265 = vmatprep.subr.bf16.mxu1 %v3928_v4  ;;  %v4016_v3 = vld [vmem:[%s4565_s21 + $0x5c8] ss:$16 sps:$4 sm:$0xff]   ;;  %v4019_v4 = vld [vmem:[%s4565_s21 + $0x5e0] ss:$16 sps:$4 sm:$0xff]  }
 0x110   : > { %1180 = vmatpush1.bf16.msra.mxu0 %v3923_v5  ;;  %1266 = vmatpush1.bf16.msra.mxu1 %v3926_v6  ;;  %v4021_v5 = vld [vmem:[%s4565_s21 + $0x5e4] ss:$16 sps:$4 sm:$0xff]   ;;  %v4022_v6 = vld [vmem:[%s4565_s21 + $0x5e8] ss:$16 sps:$4 sm:$0xff]  }
 0x111   : > { %2286 = vmatprep.subr.bf16.mxu0 %v3931_v8  ;;  %2372 = vmatprep.subr.bf16.mxu1 %v3934_v9  ;;  %v4027_v8 = vld [vmem:[%s4565_s21 + $0x604] ss:$16 sps:$4 sm:$0xff]   ;;  %v4030_v9 = vld [vmem:[%s4565_s21 + $0x60c] ss:$16 sps:$4 sm:$0xff]  }
 0x113   : > { %1182 = vmatmul.mubr.bf16.vlgmr.msra.gmra.mrb[0].mxu0 %v336_v7  ;;  %1268 = vmatmul.mubr.bf16.vlgmr.msra.gmra.mrb[0].mxu1 %v336_v7  ;;  %v4024_v7 = vld [vmem:[%s4565_s21 + $0x5ec] ss:$16 sps:$4 sm:$0xff]  }
 0x114   : > { %2287 = vmatpush1.bf16.msra.mxu0 %v3929_v10  ;;  %2373 = vmatpush1.bf16.msra.mxu1 %v3932_v11 }
 0x115   : > { %2288 = vmatprep.subr.bf16.mxu0 %v3937_v12  ;;  %2374 = vmatprep.subr.bf16.mxu1 %v3940_v13 }
 0x118   : > { %2289 = vmatpush1.bf16.msra.mxu0 %v3935_v14  ;;  %2375 = vmatpush1.bf16.msra.mxu1 %v3938_v15 }
 0x119   : > { %2290 = vmatprep.subr.bf16.mxu0 %v3943_v16  ;;  %2376 = vmatprep.subr.bf16.mxu1 %v3946_v17 }
 0x11c   : > { %2291 = vmatpush1.bf16.msra.mxu0 %v3941_v18  ;;  %2377 = vmatpush1.bf16.msra.mxu1 %v3944_v19 }
 0x11d   : > { %2292 = vmatprep.subr.bf16.mxu0 %v3949_v20  ;;  %2378 = vmatprep.subr.bf16.mxu1 %v3952_v21 }
 0x120   : > { %2293 = vmatpush1.bf16.msra.mxu0 %v3947_v22  ;;  %2379 = vmatpush1.bf16.msra.mxu1 %v3950_v23 }
 0x121   : > { %2294 = vmatprep.subr.bf16.mxu0 %v3955_v24  ;;  %2380 = vmatprep.subr.bf16.mxu1 %v3958_v25 }
 0x124   : > { %2295 = vmatpush1.bf16.msra.mxu0 %v3953_v26  ;;  %2381 = vmatpush1.bf16.msra.mxu1 %v3956_v27 }
 0x125   : > { %2296 = vmatprep.subr.bf16.mxu0 %v3961_v28  ;;  %2382 = vmatprep.subr.bf16.mxu1 %v3964_v29 }
 0x128   : > { %2297 = vmatpush1.bf16.msra.mxu0 %v3959_v30  ;;  %2383 = vmatpush1.bf16.msra.mxu1 %v3962_v31 }
 0x129   : > { %2298 = vmatprep.subr.bf16.mxu0 %v3967_v32  ;;  %2384 = vmatprep.subr.bf16.mxu1 %v3970_v33 }
 0x12c   : > { %2299 = vmatpush1.bf16.msra.mxu0 %v3965_v34  ;;  %2385 = vmatpush1.bf16.msra.mxu1 %v3968_v35 }
 0x12d   : > { %2300 = vmatprep.subr.bf16.mxu0 %v3973_v36  ;;  %2386 = vmatprep.subr.bf16.mxu1 %v3976_v37 }
 0x130   : > { %2301 = vmatpush1.bf16.msra.mxu0 %v3971_v38  ;;  %2387 = vmatpush1.bf16.msra.mxu1 %v3974_v39 }
 0x131   : > { %2302 = vmatprep.subr.bf16.mxu0 %v3979_v40  ;;  %2388 = vmatprep.subr.bf16.mxu1 %v3982_v41 }
 0x134   : > { %2303 = vmatpush1.bf16.msra.mxu0 %v3977_v42  ;;  %2389 = vmatpush1.bf16.msra.mxu1 %v3980_v43 }
 0x135   : > { %2304 = vmatprep.subr.bf16.mxu0 %v3985_v44  ;;  %2390 = vmatprep.subr.bf16.mxu1 %v3988_v45 }
 0x138   : > { %2305 = vmatpush1.bf16.msra.mxu0 %v3983_v46  ;;  %2391 = vmatpush1.bf16.msra.mxu1 %v3986_v47 }
 0x139   : > { %2306 = vmatprep.subr.bf16.mxu0 %v3991_v48  ;;  %2392 = vmatprep.subr.bf16.mxu1 %v3994_v49 }
 0x13c   : > { %2307 = vmatpush1.bf16.msra.mxu0 %v3989_v50  ;;  %2393 = vmatpush1.bf16.msra.mxu1 %v3992_v51 }
 0x13d   : > { %2308 = vmatprep.subr.bf16.mxu0 %v3997_v52  ;;  %2394 = vmatprep.subr.bf16.mxu1 %v4000_v53 }
 0x140   : > { %2309 = vmatpush1.bf16.msra.mxu0 %v3995_v54  ;;  %2395 = vmatpush1.bf16.msra.mxu1 %v3998_v55 }
 0x141   : > { %2310 = vmatprep.subr.bf16.mxu0 %v4003_v56  ;;  %2396 = vmatprep.subr.bf16.mxu1 %v4006_v57 }
 0x144   : > { %2311 = vmatpush1.bf16.msra.mxu0 %v4001_v58  ;;  %2397 = vmatpush1.bf16.msra.mxu1 %v4004_v59 }
 0x145   : > { %2312 = vmatprep.subr.bf16.mxu0 %v4009_v60  ;;  %2398 = vmatprep.subr.bf16.mxu1 %v4012_v61 }
 0x148   : > { %2313 = vmatpush1.bf16.msra.mxu0 %v4007_v62  ;;  %2399 = vmatpush1.bf16.msra.mxu1 %v4010_v63 }
 0x149   : > { %2314 = vmatprep.subr.bf16.mxu0 %v4015_v0  ;;  %2400 = vmatprep.subr.bf16.mxu1 %v4018_v1 }
 0x14c   : > { %2315 = vmatpush1.bf16.msra.mxu0 %v4013_v2  ;;  %2401 = vmatpush1.bf16.msra.mxu1 %v4016_v3 }
 0x14d   : > { %2316 = vmatprep.subr.bf16.mxu0 %v4021_v5  ;;  %2402 = vmatprep.subr.bf16.mxu1 %v4024_v7 }
 0x150   : > { %2317 = vmatpush1.bf16.msra.mxu0 %v4019_v4  ;;  %2403 = vmatpush1.bf16.msra.mxu1 %v4022_v6 }
 0x151   : > { %2329 = vmatprep.subr.bf16.mxu0 %v4027_v8  ;;  %2415 = vmatprep.subr.bf16.mxu1 %v4030_v9 }
 0x1e6   : > { %v1183_v10 = vpop.f32.mrb[0].mxu0  ;;  %v1269_v11 = vpop.f32.mrb[0].mxu1 }
 0x1e7   : > { %v1185_v12 = vpop.f32.mrb[1].mxu0  ;;  %v1271_v13 = vpop.f32.mrb[1].mxu1 }
 0x1e8   : > { %v1187_v14 = vpop.f32.mrb[2].mxu0  ;;  %v1273_v15 = vpop.f32.mrb[2].mxu1 }
 0x1e9   : > { %v1278_v16 = vadd.f32 %v1187_v14, %v1183_v10  ;;  %v1292_v17 = vadd.f32 %v1273_v15, %v1269_v11  ;;  %v1189_v18 = vpop.f32.mrb[3].mxu0  ;;  %v1275_v19 = vpop.f32.mrb[3].mxu1 }
 0x1ea   : > { %v1285_v20 = vadd.f32 %v1189_v18, %v1185_v12  ;;  %v1299_v21 = vadd.f32 %v1275_v19, %v1271_v13 }
 0x1eb   : > { %v1279_v22 = vrot.slane %v1278_v16, 4  ;;  %v1293_v23 = vrot.slane %v1292_v17, 4 }
 0x1ec   : > { %v1286_v24 = vrot.slane %v1285_v20, 4  ;;  %v1300_v25 = vrot.slane %v1299_v21, 4 }
 0x1ed   : > { %v1280_v26 = vadd.f32 %v1279_v22, %v1278_v16  ;;  %v1294_v27 = vadd.f32 %v1293_v23, %v1292_v17 }
 0x1ee   : > { %v1287_v28 = vadd.f32 %v1286_v24, %v1285_v20  ;;  %v1301_v29 = vadd.f32 %v1300_v25, %v1299_v21 }
 0x1ef   : > { %v1281_v30 = vrot.slane %v1280_v26, 2  ;;  %v1295_v31 = vrot.slane %v1294_v27, 2 }
 0x1f0   : > { %v1288_v32 = vrot.slane %v1287_v28, 2  ;;  %v1302_v33 = vrot.slane %v1301_v29, 2 }
 0x1f1   : > { %v1282_v34 = vadd.f32 %v1281_v30, %v1280_v26  ;;  %v1296_v35 = vadd.f32 %v1295_v31, %v1294_v27 }
 0x1f2   : > { %v1289_v36 = vadd.f32 %v1288_v32, %v1287_v28  ;;  %v1303_v37 = vadd.f32 %v1302_v33, %v1301_v29 }
 0x1f3   : > { %v1283_v38 = vrot.slane %v1282_v34, 1  ;;  %v1297_v39 = vrot.slane %v1296_v35, 1 }
 0x1f4   : > { %v1290_v40 = vrot.slane %v1289_v36, 1  ;;  %v1304_v41 = vrot.slane %v1303_v37, 1 }
 0x1f5   : > { %v1284_v42 = vadd.f32 %v1283_v38, %v1282_v34  ;;  %v1298_v43 = vadd.f32 %v1297_v39, %v1296_v35 }
 0x1f6   : > { %v1291_v44 = vadd.f32 %v1290_v40, %v1289_v36  ;;  %v1305_v45 = vadd.f32 %v1304_v41, %v1303_v37 }
 0x1f7   : > { %v1307_v46 = vmul.f32 0.0625, %v1284_v42  ;;  %v1309_v47 = vmul.f32 0.0625, %v1298_v43  ;;  %v1377_v42 = vlaneseq  ;;  %v4343_v43 = vmov 1983009808  }
 0x1f8   : > { %v1308_v48 = vmul.f32 0.0625, %v1291_v44  ;;  %v1310_v49 = vmul.f32 0.0625, %v1305_v45  ;;  %v1375_v44 = vunpack.c.l.s4 %v4343_v43 }
 0x1f9   : > { %v4794_v50 = vsub.f32 %v1183_v10, %v1307_v46  ;;  %v4796_v51 = vsub.f32 %v1187_v14, %v1307_v46  ;;  %v4798_v52 = vsub.f32 %v1269_v11, %v1309_v47  ;;  %v4800_v53 = vsub.f32 %v1273_v15, %v1309_v47 }
 0x1fa   : > { %v4802_v54 = vsub.f32 %v1185_v12, %v1308_v48  ;;  %v4804_v55 = vsub.f32 %v1189_v18, %v1308_v48  ;;  %v4806_v56 = vsub.f32 %v1271_v13, %v1310_v49  ;;  %v4808_v57 = vsub.f32 %v1275_v19, %v1310_v49 }
 0x1fb   : > { %v1319_v58 = vmul.f32 %v4794_v50, %v4794_v50  ;;  %v1323_v59 = vmul.f32 %v4796_v51, %v4796_v51  ;;  %v1391_v60 = vpack.c.bf16 %v4796_v51, %v4794_v50  ;;  %v1321_v61 = vmul.f32 %v4798_v52, %v4798_v52  ;;  %v4033_v51 = vld [vmem:[%s4565_s21 + $0x624] ss:$16 sps:$4 sm:$0xff]  }
 0x1fc   : > { %v1325_v62 = vmul.f32 %v4800_v53, %v4800_v53  ;;  %v1393_v63 = vpack.c.bf16 %v4800_v53, %v4798_v52  ;;  %v1320_v0 = vmul.f32 %v4802_v54, %v4802_v54  ;;  %v1324_v1 = vmul.f32 %v4804_v55, %v4804_v55  ;;  %v4036_v52 = vld [vmem:[%s4565_s21 + $0x62c] ss:$16 sps:$4 sm:$0xff]  }
 0x1fd   : > { %v1327_v2 = vadd.f32 %v1323_v59, %v1319_v58  ;;  %v1392_v3 = vpack.c.bf16 %v4804_v55, %v4802_v54  ;;  %v1322_v4 = vmul.f32 %v4806_v56, %v4806_v56  ;;  %v1326_v5 = vmul.f32 %v4808_v57, %v4808_v57  ;;  %v4840_v59 = vld [vmem:[%s4572_s15] sm:$0xff]  ;;  %v4028_v54 = vld [vmem:[%s4565_s21 + $0x608] ss:$16 sps:$4 sm:$0xff]  }
 0x1fe   : > { %v1341_v6 = vadd.f32 %v1325_v62, %v1321_v61  ;;  %v1334_v7 = vadd.f32 %v1324_v1, %v1320_v0  ;;  %v1394_v8 = vpack.c.bf16 %v4808_v57, %v4806_v56  ;;  %v4834_v45 = vshrl.u32 %v1377_v42, 7  ;;  %v4031_v55 = vld [vmem:[%s4565_s21 + $0x620] ss:$16 sps:$4 sm:$0xff]  }
 0x1ff   : > { %v1328_v9 = vrot.slane %v1327_v2, 4  ;;  %v1348_v10 = vadd.f32 %v1326_v5, %v1322_v4  ;;  %v1376_v46 = vunpack.c.0.s8 %v1375_v44  ;;  %v4344_v56 = vmov 0  }
 0x200   : > { %v1342_v11 = vrot.slane %v1341_v6, 4  ;;  %v1335_v12 = vrot.slane %v1334_v7, 4  ;;  %v1459_v47 = vsub.s32 3, %v4834_v45  ;;  %v1455_v48 = vsub.s32 1, %v4834_v45 }
 0x201   : > { %v1329_v13 = vadd.f32 %v1328_v9, %v1327_v2  ;;  %v1349_v14 = vrot.slane %v1348_v10, 4  ;;  %v1467_v49 = vsub.s32 7, %v4834_v45  ;;  %v4843_v62 = vsub.s32 %v1376_v46, %v4834_v45 }
 0x202   : > { %v1343_v15 = vadd.f32 %v1342_v11, %v1341_v6  ;;  %v1336_v16 = vadd.f32 %v1335_v12, %v1334_v7  ;;  %v1460_v0 = vrot.slane %v4840_v59, %v1459_v47  ;;  %v1456_v1 = vrot.slane %v4840_v59, %v1455_v48 }
 0x203   : > { %v1330_v17 = vrot.slane %v1329_v13, 2  ;;  %v1350_v18 = vadd.f32 %v1349_v14, %v1348_v10  ;;  %v1468_v6 = vrot.slane %v4840_v59, %v1467_v49 }
 0x204   : > { %v1344_v19 = vrot.slane %v1343_v15, 2  ;;  %v1337_v20 = vrot.slane %v1336_v16, 2  ;;  %v1474_v10 = vpack.c.bf16 %v1460_v0, %v1460_v0  ;;  %v1473_v11 = vpack.c.bf16 %v1456_v1, %v1456_v1 }
 0x205   : > { %v1331_v21 = vadd.f32 %v1330_v17, %v1329_v13  ;;  %v1351_v22 = vrot.slane %v1350_v18, 2  ;;  %v4857_v13 = vsub.s32 0, %v4834_v45  ;;  %v1476_v14 = vpack.c.bf16 %v1468_v6, %v1468_v6  ;;  %v4040_v6 = vld [vmem:[%s4565_s21 + $0x648] ss:$16 sps:$4 sm:$0xff]  }
 0x206   : > { %v1345_v23 = vadd.f32 %v1344_v19, %v1343_v15  ;;  %v1338_v24 = vadd.f32 %v1337_v20, %v1336_v16  ;;  %v1410_v16 = vsub.s32 6, %v4834_v45  ;;  %v1402_v17 = vsub.s32 2, %v4834_v45 }
 0x207   : > { %v1332_v25 = vrot.slane %v1331_v21, 1  ;;  %v1352_v26 = vadd.f32 %v1351_v22, %v1350_v18  ;;  %v1406_v18 = vsub.s32 4, %v4834_v45  ;;  %v1486_v19 = vshrl.u32 %v1474_v10, 16  ;;  %v4043_v10 = vld [vmem:[%s4565_s21 + $0x660] ss:$16 sps:$4 sm:$0xff]  }
 0x208   : > { %v1346_v27 = vrot.slane %v1345_v23, 1  ;;  %v1339_v28 = vrot.slane %v1338_v24, 1  ;;  %v1478_v20 = vshrl.u32 %v1473_v11, 16  ;;  %v1502_v22 = vshrl.u32 %v1476_v14, 16  ;;  %v4046_v11 = vld [vmem:[%s4565_s21 + $0x668] ss:$16 sps:$4 sm:$0xff]  }
 0x209   : > { %v1333_v29 = vadd.f32 %v1332_v25, %v1331_v21  ;;  %v1353_v30 = vrot.slane %v1352_v26, 1  ;;  %v4054_v14 = vld [vmem:[%s4565_s21 + $0x68c] ss:$16 sps:$4 sm:$0xff]  }
 0x20a   : > { %v1347_v31 = vadd.f32 %v1346_v27, %v1345_v23  ;;  %v1340_v32 = vadd.f32 %v1339_v28, %v1338_v24  ;;  %v1487_v27 = vpack.i.b16 %v1486_v19, %v1486_v19  ;;  %v1479_v28 = vpack.i.b16 %v1478_v20, %v1478_v20  ;;  %v4052_v19 = vld [vmem:[%s4565_s21 + $0x688] ss:$16 sps:$4 sm:$0xff]   ;;  %v4057_v20 = vld [vmem:[%s4565_s21 + $0x6a4] ss:$16 sps:$4 sm:$0xff]  }
 0x20b   : > { %v1355_v33 = vmul.f32 0.0625, %v1333_v29  ;;  %v1354_v34 = vadd.f32 %v1353_v30, %v1352_v26 }
 0x20c   : > { %v1357_v35 = vmul.f32 0.0625, %v1347_v31  ;;  %v1356_v36 = vmul.f32 0.0625, %v1340_v32 }
 0x20d   : > { %v1360_v37 = vadd.f32 1e-05, %v1355_v33  ;;  %v1358_v38 = vmul.f32 0.0625, %v1354_v34  ;;  %v1503_v33 = vpack.i.b16 %v1502_v22, %v1502_v22  ;;  %v4055_v22 = vld [vmem:[%s4565_s21 + $0x6a0] ss:$16 sps:$4 sm:$0xff]  }
 0x20e   : > { %v1362_v39 = vadd.f32 1e-05, %v1357_v35  ;;  %v1361_v40 = vadd.f32 1e-05, %v1356_v36 }
 0x20f   : > { %4121 = vrsqrt.f32 %v1360_v37  ;;  %v1363_v41 = vadd.f32 1e-05, %v1358_v38  ;;  %v1492_v38 = vrot.slane %v1487_v27, %v4857_v13  ;;  %v1508_v44 = vrot.slane %v1503_v33, %v4857_v13  ;;  %v4064_v27 = vld [vmem:[%s4565_s21 + $0x6c8] ss:$16 sps:$4 sm:$0xff]   ;;  %v4078_v33 = vld [vmem:[%s4565_s21 + $0x70c] ss:$16 sps:$4 sm:$0xff]  }
 0x210   : > { %4123 = vrsqrt.f32 %v1362_v39  ;;  %v1484_v39 = vrot.slane %v1479_v28, %v4857_v13  ;;  %v4069_v28 = vld [vmem:[%s4565_s21 + $0x6e4] ss:$16 sps:$4 sm:$0xff]  }
 0x211   : > { %4125 = vrsqrt.f32 %v1361_v40 }
 0x212   : > { %4127 = vrsqrt.f32 %v1363_v41 }
 0x219   : > { %v4122_v58 = vpop.eup %4121 }
 0x21a   : > { %v4124_v61 = vpop.eup %4123 }
 0x21b   : > { %v4126_v2 = vpop.eup %4125 }
 0x21c   : > { %v4128_v4 = vpop.eup %4127  ;;  %v1372_v5 = vcombine.low %v4122_v58, %v4126_v2 }
 0x21d   : > { %v1373_v7 = vcombine.low %v4124_v61, %v4128_v4 }
 0x21e   : > { %v1380_v9 = vrot.slane %v1372_v5, %v4843_v62  ;;  %v4037_v5 = vld [vmem:[%s4565_s21 + $0x640] ss:$16 sps:$4 sm:$0xff]  }
 0x21f   : > { %v1387_v12 = vrot.slane %v1373_v7, %v4843_v62  ;;  %v4045_v7 = vld [vmem:[%s4565_s21 + $0x664] ss:$16 sps:$4 sm:$0xff]  }
 0x221   : > { %v1388_v15 = vcombine.low %v1380_v9, %v1387_v12  ;;  %v4048_v9 = vld [vmem:[%s4565_s21 + $0x66c] ss:$16 sps:$4 sm:$0xff]   ;;  %v4051_v12 = vld [vmem:[%s4565_s21 + $0x684] ss:$16 sps:$4 sm:$0xff]  }
 0x223   : > { %v1390_v21 = vmul.f32 %v1388_v15, %v4840_v59  ;;  %v4049_v15 = vld [vmem:[%s4565_s21 + $0x680] ss:$16 sps:$4 sm:$0xff]  }
 0x225   : > { %v1411_v23 = vrot.slane %v1390_v21, %v1410_v16  ;;  %v1403_v24 = vrot.slane %v1390_v21, %v1402_v17  ;;  %v1399_v25 = vrot.slane %v1390_v21, %v4857_v13  ;;  %v1407_v26 = vrot.slane %v1390_v21, %v1406_v18  ;;  %v4060_v21 = vld [vmem:[%s4565_s21 + $0x6ac] ss:$16 sps:$4 sm:$0xff]  }
 0x227   : > { %v1419_v29 = vpack.c.bf16 %v1411_v23, %v1411_v23  ;;  %v1417_v30 = vpack.c.bf16 %v1403_v24, %v1403_v24  ;;  %v1416_v31 = vpack.c.bf16 %v1399_v25, %v1399_v25  ;;  %v1418_v32 = vpack.c.bf16 %v1407_v26, %v1407_v26  ;;  %v4058_v23 = vld [vmem:[%s4565_s21 + $0x6a8] ss:$16 sps:$4 sm:$0xff]   ;;  %v4063_v24 = vld [vmem:[%s4565_s21 + $0x6c4] ss:$16 sps:$4 sm:$0xff]   ;;  %v4066_v25 = vld [vmem:[%s4565_s21 + $0x6cc] ss:$16 sps:$4 sm:$0xff]  }
 0x228   : > { %v4061_v26 = vld [vmem:[%s4565_s21 + $0x6c0] ss:$16 sps:$4 sm:$0xff]  }
 0x229   : > { %v1442_v34 = vpack.i.b16 %v1419_v29, %v1419_v29  ;;  %v1428_v35 = vpack.i.b16 %v1417_v30, %v1417_v30  ;;  %v1421_v36 = vpack.i.b16 %v1416_v31, %v1416_v31  ;;  %v1435_v37 = vpack.i.b16 %v1418_v32, %v1418_v32  ;;  %v4072_v29 = vld [vmem:[%s4565_s21 + $0x6ec] ss:$16 sps:$4 sm:$0xff]   ;;  %v4067_v30 = vld [vmem:[%s4565_s21 + $0x6e0] ss:$16 sps:$4 sm:$0xff]   ;;  %v4070_v31 = vld [vmem:[%s4565_s21 + $0x6e8] ss:$16 sps:$4 sm:$0xff]  }
 0x22a   : > { %v4075_v32 = vld [vmem:[%s4565_s21 + $0x704] ss:$16 sps:$4 sm:$0xff]  }
 0x22b   : > { %v1447_v40 = vrot.slane %v1442_v34, %v4857_v13  ;;  %v1433_v41 = vrot.slane %v1428_v35, %v4857_v13  ;;  %v1426_v42 = vrot.slane %v1421_v36, %v4857_v13  ;;  %v1440_v43 = vrot.slane %v1435_v37, %v4857_v13  ;;  %v4073_v34 = vld [vmem:[%s4565_s21 + $0x700] ss:$16 sps:$4 sm:$0xff]   ;;  %v4076_v35 = vld [vmem:[%s4565_s21 + $0x708] ss:$16 sps:$4 sm:$0xff]   ;;  %v4081_v36 = vld [vmem:[%s4565_s21 + $0x724] ss:$16 sps:$4 sm:$0xff]  }
 0x22c   : > { %v4084_v37 = vld [vmem:[%s4565_s21 + $0x72c] ss:$16 sps:$4 sm:$0xff]  }
 0x22d   : > { %v1451_v46 = vmul.bf16 %v1447_v40, %v1394_v8  ;;  %v1449_v58 = vmul.bf16 %v1433_v41, %v1392_v3  ;;  %v1448_v61 = vmul.bf16 %v1426_v42, %v1391_v60  ;;  %v4889_v0 = vmul.bf16 %v1440_v43, %v1393_v63  ;;  %v4025_v8 = vld [vmem:[%s4565_s21 + $0x600] ss:$16 sps:$4 sm:$0xff]   ;;  %v4034_v60 = vld [vmem:[%s4565_s21 + $0x628] ss:$16 sps:$4 sm:$0xff]   ;;  %v4039_v63 = vld [vmem:[%s4565_s21 + $0x644] ss:$16 sps:$4 sm:$0xff]  }
 0x22e   : > { %v4042_v3 = vld [vmem:[%s4565_s21 + $0x64c] ss:$16 sps:$4 sm:$0xff]   ;;  %v4087_v40 = vld [vmem:[%s4565_s21 + $0x744] ss:$16 sps:$4 sm:$0xff]   ;;  %v1463_v42 = vsub.s32 5, %v4834_v45 }
 0x22f   : > { %v1510_v1 = vadd.bf16 %v1492_v38, %v1449_v58  ;;  %v1509_v2 = vadd.bf16 %v1484_v39, %v1448_v61  ;;  %v1512_v4 = vadd.bf16 %v1508_v44, %v1451_v46  ;;  %v4079_v38 = vld [vmem:[%s4565_s21 + $0x720] ss:$16 sps:$4 sm:$0xff]   ;;  %v4082_v39 = vld [vmem:[%s4565_s21 + $0x728] ss:$16 sps:$4 sm:$0xff]   ;;  %v4090_v41 = vld [vmem:[%s4565_s21 + $0x74c] ss:$16 sps:$4 sm:$0xff]  }
 0x230   : > { %v4085_v43 = vld [vmem:[%s4565_s21 + $0x740] ss:$16 sps:$4 sm:$0xff]   ;;  %v4088_v44 = vld [vmem:[%s4565_s21 + $0x748] ss:$16 sps:$4 sm:$0xff]   ;;  %v4093_v46 = vld [vmem:[%s4565_s21 + $0x764] ss:$16 sps:$4 sm:$0xff]   ;;  %v1464_v61 = vrot.slane %v4840_v59, %v1463_v42 }
 0x231   : > { %v1514_v57 = vmax.bf16 %v4344_v56, %v1510_v1  ;;  %v1513_v50 = vmax.bf16 %v4344_v56, %v1509_v2  ;;  %v1516_v53 = vmax.bf16 %v4344_v56, %v1512_v4  ;;  %v4096_v58 = vld [vmem:[%s4565_s21 + $0x76c] ss:$16 sps:$4 sm:$0xff]   ;;  %v4091_v1 = vld [vmem:[%s4565_s21 + $0x760] ss:$16 sps:$4 sm:$0xff]   ;;  %v4094_v2 = vld [vmem:[%s4565_s21 + $0x768] ss:$16 sps:$4 sm:$0xff]  }
 0x232   : > { %v4099_v4 = vld [vmem:[%s4565_s21 + $0x784] ss:$16 sps:$4 sm:$0xff]  }
 0x233   : > { %2318 = vmatprep.mubr.bf16.mxu0 %v1514_v57  ;;  %2404 = vmatprep.mubr.bf16.mxu1 %v1514_v57  ;;  %v4102_v57 = vld [vmem:[%s4565_s21 + $0x78c] ss:$16 sps:$4 sm:$0xff]   ;;  %v4105_v59 = vld [vmem:[%s4565_s21 + $0x7a4] ss:$16 sps:$4 sm:$0xff]  }
 0x234   : > { %2319 = vmatmul.mubr.bf16.vlgmr.msra.gmra.mrb[4].mxu0 %v1513_v50  ;;  %2405 = vmatmul.mubr.bf16.vlgmr.msra.gmra.mrb[4].mxu1 %v1513_v50  ;;  %v4100_v50 = vld [vmem:[%s4565_s21 + $0x788] ss:$16 sps:$4 sm:$0xff]  }
 0x235   : > { %2330 = vmatpush1.bf16.msra.mxu0 %v4025_v8  ;;  %2416 = vmatpush1.bf16.msra.mxu1 %v4028_v54  ;;  %v1475_v8 = vpack.c.bf16 %v1464_v61, %v1464_v61  ;;  %v4097_v54 = vld [vmem:[%s4565_s21 + $0x780] ss:$16 sps:$4 sm:$0xff]  }
 0x236   : > { %2361 = vmatprep.mubr.bf16.mxu0 %v1516_v53  ;;  %2447 = vmatprep.mubr.bf16.mxu1 %v1516_v53  ;;  %v4103_v53 = vld [vmem:[%s4565_s21 + $0x7a0] ss:$16 sps:$4 sm:$0xff]  }
 0x237   : > { %2331 = vmatprep.subr.bf16.mxu0 %v4033_v51  ;;  %2417 = vmatprep.subr.bf16.mxu1 %v4036_v52  ;;  %v4108_v51 = vld [vmem:[%s4565_s21 + $0x7ac] ss:$16 sps:$4 sm:$0xff]   ;;  %v1494_v52 = vshrl.u32 %v1475_v8, 16 }
 0x239   : > { %2332 = vmatpush1.bf16.msra.mxu0 %v4031_v55  ;;  %2418 = vmatpush1.bf16.msra.mxu1 %v4034_v60  ;;  %v4106_v55 = vld [vmem:[%s4565_s21 + $0x7a8] ss:$16 sps:$4 sm:$0xff]   ;;  %v4111_v60 = vld [vmem:[%s4565_s21 + $0x7c4] ss:$16 sps:$4 sm:$0xff]  }
 0x23a   : > { %2333 = vmatprep.subr.bf16.mxu0 %v4039_v63  ;;  %2419 = vmatprep.subr.bf16.mxu1 %v4042_v3  ;;  %v4114_v63 = vld [vmem:[%s4565_s21 + $0x7cc] ss:$16 sps:$4 sm:$0xff]   ;;  %v1495_v3 = vpack.i.b16 %v1494_v52, %v1494_v52 }
 0x23d   : > { %2334 = vmatpush1.bf16.msra.mxu0 %v4037_v5  ;;  %2420 = vmatpush1.bf16.msra.mxu1 %v4040_v6  ;;  %v4109_v5 = vld [vmem:[%s4565_s21 + $0x7c0] ss:$16 sps:$4 sm:$0xff]   ;;  %v4112_v6 = vld [vmem:[%s4565_s21 + $0x7c8] ss:$16 sps:$4 sm:$0xff]  }
 0x23e   : > { %2335 = vmatprep.subr.bf16.mxu0 %v4045_v7  ;;  %2421 = vmatprep.subr.bf16.mxu1 %v4048_v9  ;;  %v4117_v7 = vld [vmem:[%s4565_s21 + $0x7e4] ss:$16 sps:$4 sm:$0xff]   ;;  %v4120_v9 = vld [vmem:[%s4565_s21 + $0x7ec] ss:$16 sps:$4 sm:$0xff]  }
 0x241   : > { %2336 = vmatpush1.bf16.msra.mxu0 %v4043_v10  ;;  %2422 = vmatpush1.bf16.msra.mxu1 %v4046_v11  ;;  %v1500_v10 = vrot.slane %v1495_v3, %v4857_v13  ;;  %v4115_v11 = vld [vmem:[%s4565_s21 + $0x7e0] ss:$16 sps:$4 sm:$0xff]  }
 0x242   : > { %2337 = vmatprep.subr.bf16.mxu0 %v4051_v12  ;;  %2423 = vmatprep.subr.bf16.mxu1 %v4054_v14  ;;  %v4118_v12 = vld [vmem:[%s4565_s21 + $0x7e8] ss:$16 sps:$4 sm:$0xff]  }
 0x243   : > { %v1511_v14 = vadd.bf16 %v1500_v10, %v4889_v0 }
 0x245   : > { %2338 = vmatpush1.bf16.msra.mxu0 %v4049_v15  ;;  %2424 = vmatpush1.bf16.msra.mxu1 %v4052_v19  ;;  %v1515_v15 = vmax.bf16 %v4344_v56, %v1511_v14 }
 0x246   : > { %2339 = vmatprep.subr.bf16.mxu0 %v4057_v20  ;;  %2425 = vmatprep.subr.bf16.mxu1 %v4060_v21 }
 0x249   : > { %2340 = vmatpush1.bf16.msra.mxu0 %v4055_v22  ;;  %2426 = vmatpush1.bf16.msra.mxu1 %v4058_v23 }
 0x24a   : > { %2341 = vmatprep.subr.bf16.mxu0 %v4063_v24  ;;  %2427 = vmatprep.subr.bf16.mxu1 %v4066_v25 }
 0x24d   : > { %2342 = vmatpush1.bf16.msra.mxu0 %v4061_v26  ;;  %2428 = vmatpush1.bf16.msra.mxu1 %v4064_v27 }
 0x24e   : > { %2343 = vmatprep.subr.bf16.mxu0 %v4069_v28  ;;  %2429 = vmatprep.subr.bf16.mxu1 %v4072_v29 }
 0x251   : > { %2344 = vmatpush1.bf16.msra.mxu0 %v4067_v30  ;;  %2430 = vmatpush1.bf16.msra.mxu1 %v4070_v31 }
 0x252   : > { %2345 = vmatprep.subr.bf16.mxu0 %v4075_v32  ;;  %2431 = vmatprep.subr.bf16.mxu1 %v4078_v33 }
 0x255   : > { %2346 = vmatpush1.bf16.msra.mxu0 %v4073_v34  ;;  %2432 = vmatpush1.bf16.msra.mxu1 %v4076_v35 }
 0x256   : > { %2347 = vmatprep.subr.bf16.mxu0 %v4081_v36  ;;  %2433 = vmatprep.subr.bf16.mxu1 %v4084_v37 }
 0x259   : > { %2348 = vmatpush1.bf16.msra.mxu0 %v4079_v38  ;;  %2434 = vmatpush1.bf16.msra.mxu1 %v4082_v39 }
 0x25a   : > { %2349 = vmatprep.subr.bf16.mxu0 %v4087_v40  ;;  %2435 = vmatprep.subr.bf16.mxu1 %v4090_v41 }
 0x25d   : > { %2350 = vmatpush1.bf16.msra.mxu0 %v4085_v43  ;;  %2436 = vmatpush1.bf16.msra.mxu1 %v4088_v44 }
 0x25e   : > { %2351 = vmatprep.subr.bf16.mxu0 %v4093_v46  ;;  %2437 = vmatprep.subr.bf16.mxu1 %v4096_v58 }
 0x261   : > { %2352 = vmatpush1.bf16.msra.mxu0 %v4091_v1  ;;  %2438 = vmatpush1.bf16.msra.mxu1 %v4094_v2 }
 0x262   : > { %2353 = vmatprep.subr.bf16.mxu0 %v4099_v4  ;;  %2439 = vmatprep.subr.bf16.mxu1 %v4102_v57 }
 0x265   : > { %2354 = vmatpush1.bf16.msra.mxu0 %v4097_v54  ;;  %2440 = vmatpush1.bf16.msra.mxu1 %v4100_v50 }
 0x266   : > { %2355 = vmatprep.subr.bf16.mxu0 %v4105_v59  ;;  %2441 = vmatprep.subr.bf16.mxu1 %v4108_v51 }
 0x269   : > { %2356 = vmatpush1.bf16.msra.mxu0 %v4103_v53  ;;  %2442 = vmatpush1.bf16.msra.mxu1 %v4106_v55 }
 0x26a   : > { %2357 = vmatprep.subr.bf16.mxu0 %v4111_v60  ;;  %2443 = vmatprep.subr.bf16.mxu1 %v4114_v63 }
 0x26d   : > { %2358 = vmatpush1.bf16.msra.mxu0 %v4109_v5  ;;  %2444 = vmatpush1.bf16.msra.mxu1 %v4112_v6 }
 0x26e   : > { %2359 = vmatprep.subr.bf16.mxu0 %v4117_v7  ;;  %2445 = vmatprep.subr.bf16.mxu1 %v4120_v9 }
 0x271   : > { %2360 = vmatpush1.bf16.msra.mxu0 %v4115_v11  ;;  %2446 = vmatpush1.bf16.msra.mxu1 %v4118_v12 }
 0x274   : > { %2362 = vmatmul.mubr.bf16.vlgmr.msra.gmra.mrb[4].mxu0 %v1515_v15  ;;  %2448 = vmatmul.mubr.bf16.vlgmr.msra.gmra.mrb[4].mxu1 %v1515_v15 }
 0x347   : > { %v2363_v19 = vpop.f32.mrb[4].mxu0  ;;  %v2449_v20 = vpop.f32.mrb[4].mxu1 }
 0x348   : > { %v2365_v21 = vpop.f32.mrb[5].mxu0  ;;  %v2451_v22 = vpop.f32.mrb[5].mxu1 }
 0x349   : > { %v2367_v23 = vpop.f32.mrb[6].mxu0  ;;  %v2453_v24 = vpop.f32.mrb[6].mxu1 }
 0x34a   : > { %v2458_v25 = vadd.f32 %v2367_v23, %v2363_v19  ;;  %v2472_v26 = vadd.f32 %v2453_v24, %v2449_v20  ;;  %v2369_v27 = vpop.f32.mrb[7].mxu0  ;;  %v2455_v28 = vpop.f32.mrb[7].mxu1 }
 0x34b   : > { %v2465_v29 = vadd.f32 %v2369_v27, %v2365_v21  ;;  %v2479_v30 = vadd.f32 %v2455_v28, %v2451_v22 }
 0x34c   : > { %v2459_v31 = vrot.slane %v2458_v25, 4  ;;  %v2473_v0 = vrot.slane %v2472_v26, 4 }
 0x34d   : > { %v2466_v32 = vrot.slane %v2465_v29, 4  ;;  %v2480_v33 = vrot.slane %v2479_v30, 4 }
 0x34e   : > { %v2460_v34 = vadd.f32 %v2459_v31, %v2458_v25  ;;  %v2474_v35 = vadd.f32 %v2473_v0, %v2472_v26 }
 0x34f   : > { %v2467_v36 = vadd.f32 %v2466_v32, %v2465_v29  ;;  %v2481_v37 = vadd.f32 %v2480_v33, %v2479_v30 }
 0x350   : > { %v2461_v38 = vrot.slane %v2460_v34, 2  ;;  %v2475_v39 = vrot.slane %v2474_v35, 2 }
 0x351   : > { %v2468_v40 = vrot.slane %v2467_v36, 2  ;;  %v2482_v41 = vrot.slane %v2481_v37, 2 }
 0x352   : > { %v2462_v43 = vadd.f32 %v2461_v38, %v2460_v34  ;;  %v2476_v44 = vadd.f32 %v2475_v39, %v2474_v35 }
 0x353   : > { %v2469_v46 = vadd.f32 %v2468_v40, %v2467_v36  ;;  %v2483_v58 = vadd.f32 %v2482_v41, %v2481_v37 }
 0x354   : > { %v2463_v61 = vrot.slane %v2462_v43, 1  ;;  %v2477_v1 = vrot.slane %v2476_v44, 1 }
 0x355   : > { %v2470_v2 = vrot.slane %v2469_v46, 1  ;;  %v2484_v4 = vrot.slane %v2483_v58, 1 }
 0x356   : > { %v2464_v57 = vadd.f32 %v2463_v61, %v2462_v43  ;;  %v2478_v8 = vadd.f32 %v2477_v1, %v2476_v44 }
 0x357   : > { %v2471_v54 = vadd.f32 %v2470_v2, %v2469_v46  ;;  %v2485_v50 = vadd.f32 %v2484_v4, %v2483_v58 }
 0x358   : > { %v2486_v59 = vmul.f32 0.0625, %v2464_v57  ;;  %v2488_v51 = vmul.f32 0.0625, %v2478_v8 }
 0x359   : > { %v2487_v52 = vmul.f32 0.0625, %v2471_v54  ;;  %v2489_v53 = vmul.f32 0.0625, %v2485_v50 }
 0x35a   : > { %v4963_v55 = vsub.f32 %v2363_v19, %v2486_v59  ;;  %v4965_v60 = vsub.f32 %v2367_v23, %v2486_v59  ;;  %v4967_v63 = vsub.f32 %v2449_v20, %v2488_v51  ;;  %v4969_v3 = vsub.f32 %v2453_v24, %v2488_v51 }
 0x35b   : > { %v4971_v5 = vsub.f32 %v2365_v21, %v2487_v52  ;;  %v4973_v6 = vsub.f32 %v2369_v27, %v2487_v52  ;;  %v4975_v7 = vsub.f32 %v2451_v22, %v2489_v53  ;;  %v4977_v9 = vsub.f32 %v2455_v28, %v2489_v53 }
 0x35c   : > { %v2498_v10 = vmul.f32 %v4963_v55, %v4963_v55  ;;  %v2502_v11 = vmul.f32 %v4965_v60, %v4965_v60  ;;  %v2571_v12 = vpack.c.bf16 %v4965_v60, %v4963_v55  ;;  %v2500_v14 = vmul.f32 %v4967_v63, %v4967_v63 }
 0x35d   : > { %v2504_v15 = vmul.f32 %v4969_v3, %v4969_v3  ;;  %v2573_v19 = vpack.c.bf16 %v4969_v3, %v4967_v63  ;;  %v2499_v20 = vmul.f32 %v4971_v5, %v4971_v5  ;;  %v2503_v21 = vmul.f32 %v4973_v6, %v4973_v6  ;;  %v4137_v63 = vld [vmem:[#allocation7 + $0x40] sm:$0xff] (!%p3549_p12)  }
 0x35e   : > { %v2506_v22 = vadd.f32 %v2502_v11, %v2498_v10  ;;  %v2572_v23 = vpack.c.bf16 %v4973_v6, %v4971_v5  ;;  %v2501_v24 = vmul.f32 %v4975_v7, %v4975_v7  ;;  %v2505_v25 = vmul.f32 %v4977_v9, %v4977_v9  ;;  %v4138_v3 = vld [vmem:[#allocation7 + $0xc0] sm:$0xff] (!%p3549_p12)   ;;  %3598 = vmatprep.subr.bf16.mxu0 (!%p3549_p12), %v4137_v63 }
 0x35f   : > { %v2520_v26 = vadd.f32 %v2504_v15, %v2500_v14  ;;  %v2513_v27 = vadd.f32 %v2503_v21, %v2499_v20  ;;  %v2574_v28 = vpack.c.bf16 %v4977_v9, %v4975_v7  ;;  %v3548_v15 = vld [vmem:[%s4572_s15 + $0x8] sm:$0xff]  ;;  %v4139_v6 = vld [vmem:[#allocation7] sm:$0xff] (!%p3549_p12)   ;;  %3620 = vmatprep.subr.bf16.mxu1 (!%p3549_p12), %v4138_v3 }
 0x360   : > { %v2507_v29 = vrot.slane %v2506_v22, 4  ;;  %v2527_v30 = vadd.f32 %v2505_v25, %v2501_v24  ;;  %v2640_v21 = vrot.slane %v3548_v15, %v1459_v47  ;;  %v2636_v24 = vrot.slane %v3548_v15, %v1455_v48  ;;  %v4140_v7 = vld [vmem:[#allocation7 + $0x80] sm:$0xff] (!%p3549_p12)   ;;  %3599 = vmatpush3.bf16.msra.mxu0 (!%p3549_p12), %v4139_v6  ;;  %v4141_v9 = vld [vmem:[#allocation7 + $0x48] sm:$0xff] (!%p3549_p12)  }
 0x361   : > { %v2521_v31 = vrot.slane %v2520_v26, 4  ;;  %v2514_v0 = vrot.slane %v2513_v27, 4  ;;  %v2644_v25 = vrot.slane %v3548_v15, %v1463_v42  ;;  %3621 = vmatpush3.bf16.msra.mxu1 (!%p3549_p12), %v4140_v7  ;;  %3600 = vmatprep.subr.bf16.mxu0 (!%p3549_p12), %v4141_v9 }
 0x362   : > { %v2508_v32 = vadd.f32 %v2507_v29, %v2506_v22  ;;  %v2528_v33 = vrot.slane %v2527_v30, 4 }
 0x363   : > { %v2522_v34 = vadd.f32 %v2521_v31, %v2520_v26  ;;  %v2515_v35 = vadd.f32 %v2514_v0, %v2513_v27  ;;  %v2648_v26 = vrot.slane %v3548_v15, %v1467_v49  ;;  %v2654_v31 = vpack.c.bf16 %v2640_v21, %v2640_v21 }
 0x364   : > { %v2509_v36 = vrot.slane %v2508_v32, 2  ;;  %v2529_v37 = vadd.f32 %v2528_v33, %v2527_v30  ;;  %v2655_v33 = vpack.c.bf16 %v2644_v25, %v2644_v25  ;;  %v4147_v25 = vld [vmem:[#allocation7 + $0x10] sm:$0xff] (!%p3549_p12)  }
 0x365   : > { %v2523_v38 = vrot.slane %v2522_v34, 2  ;;  %v2516_v39 = vrot.slane %v2515_v35, 2  ;;  %v2656_v47 = vpack.c.bf16 %v2648_v26, %v2648_v26  ;;  %v2666_v48 = vshrl.u32 %v2654_v31, 16  ;;  %v4148_v26 = vld [vmem:[#allocation7 + $0x90] sm:$0xff] (!%p3549_p12)   ;;  %v4152_v31 = vld [vmem:[#allocation7 + $0x98] sm:$0xff] (!%p3549_p12)  }
 0x366   : > { %v2510_v40 = vadd.f32 %v2509_v36, %v2508_v32  ;;  %v2530_v41 = vrot.slane %v2529_v37, 2  ;;  %v2653_v32 = vpack.c.bf16 %v2636_v24, %v2636_v24 }
 0x367   : > { %v2524_v43 = vadd.f32 %v2523_v38, %v2522_v34  ;;  %v2517_v44 = vadd.f32 %v2516_v39, %v2515_v35  ;;  %v2674_v38 = vshrl.u32 %v2655_v33, 16  ;;  %v2682_v42 = vshrl.u32 %v2656_v47, 16  ;;  %v4155_v33 = vld [vmem:[#allocation7 + $0x20] sm:$0xff] (!%p3549_p12)   ;;  %v4157_v47 = vld [vmem:[#allocation7 + $0x68] sm:$0xff] (!%p3549_p12)  }
 0x368   : > { %v2511_v46 = vrot.slane %v2510_v40, 1  ;;  %v2531_v58 = vadd.f32 %v2530_v41, %v2529_v37  ;;  %v2658_v37 = vshrl.u32 %v2653_v32, 16  ;;  %v4154_v32 = vld [vmem:[#allocation7 + $0xe0] sm:$0xff] (!%p3549_p12)  }
 0x369   : > { %v2525_v61 = vrot.slane %v2524_v43, 1  ;;  %v2518_v1 = vrot.slane %v2517_v44, 1 }
 0x36a   : > { %v2512_v2 = vadd.f32 %v2511_v46, %v2510_v40  ;;  %v2532_v4 = vrot.slane %v2531_v58, 1  ;;  %v2659_v46 = vpack.i.b16 %v2658_v37, %v2658_v37  ;;  %v4161_v37 = vld [vmem:[#allocation7 + $0x70] sm:$0xff] (!%p3549_p12)  }
 0x36b   : > { %v2526_v57 = vadd.f32 %v2525_v61, %v2524_v43  ;;  %v2519_v8 = vadd.f32 %v2518_v1, %v2517_v44  ;;  %v2667_v44 = vpack.i.b16 %v2666_v48, %v2666_v48  ;;  %v4160_v48 = vld [vmem:[#allocation7 + $0xa8] sm:$0xff] (!%p3549_p12)  }
 0x36c   : > { %v2534_v54 = vmul.f32 0.0625, %v2512_v2  ;;  %v2533_v50 = vadd.f32 %v2532_v4, %v2531_v58  ;;  %v2683_v58 = vpack.i.b16 %v2682_v42, %v2682_v42  ;;  %v4163_v42 = vld [vmem:[#allocation7 + $0x30] sm:$0xff] (!%p3549_p12)  }
 0x36d   : > { %v2536_v59 = vmul.f32 0.0625, %v2526_v57  ;;  %v2535_v51 = vmul.f32 0.0625, %v2519_v8 }
 0x36e   : > { %v2540_v52 = vadd.f32 1e-05, %v2534_v54  ;;  %v2537_v53 = vmul.f32 0.0625, %v2533_v50  ;;  %v2688_v45 = vrot.slane %v2683_v58, %v4857_v13 }
 0x36f   : > { %v2542_v10 = vadd.f32 1e-05, %v2536_v59  ;;  %v2541_v11 = vadd.f32 1e-05, %v2535_v51  ;;  %v2664_v59 = vrot.slane %v2659_v46, %v4857_v13 }
 0x370   : > { %4129 = vrsqrt.f32 %v2540_v52  ;;  %v2543_v14 = vadd.f32 1e-05, %v2537_v53 }
 0x371   : > { %4131 = vrsqrt.f32 %v2542_v10 }
 0x372   : > { %4133 = vrsqrt.f32 %v2541_v11 }
 0x373   : > { %4135 = vrsqrt.f32 %v2543_v14 }
 0x37a   : > { %v4130_v20 = vpop.eup %4129 }
 0x37b   : > { %v4132_v22 = vpop.eup %4131 }
 0x37c   : > { %v4134_v27 = vpop.eup %4133 }
 0x37d   : > { %v4136_v29 = vpop.eup %4135  ;;  %v2552_v30 = vcombine.low %v4130_v20, %v4134_v27  ;;  %v4149_v27 = vld [vmem:[#allocation7 + $0x58] sm:$0xff] (!%p3549_p12)  }
 0x37e   : > { %v2553_v0 = vcombine.low %v4132_v22, %v4136_v29  ;;  %v4150_v29 = vld [vmem:[#allocation7 + $0xd8] sm:$0xff] (!%p3549_p12)  }
 0x37f   : > { %v2560_v34 = vrot.slane %v2552_v30, %v4843_v62  ;;  %v4151_v30 = vld [vmem:[#allocation7 + $0x18] sm:$0xff] (!%p3549_p12)  }
 0x380   : > { %v2567_v35 = vrot.slane %v2553_v0, %v4843_v62  ;;  %v2675_v62 = vpack.i.b16 %v2674_v38, %v2674_v38  ;;  %v4153_v0 = vld [vmem:[#allocation7 + $0x60] sm:$0xff] (!%p3549_p12)   ;;  %v4162_v38 = vld [vmem:[#allocation7 + $0xf0] sm:$0xff] (!%p3549_p12)  }
 0x382   : > { %v2568_v36 = vcombine.low %v2560_v34, %v2567_v35  ;;  %v4156_v34 = vld [vmem:[#allocation7 + $0xa0] sm:$0xff] (!%p3549_p12)   ;;  %v4158_v35 = vld [vmem:[#allocation7 + $0xe8] sm:$0xff] (!%p3549_p12)  }
 0x384   : > { %v2570_v39 = vmul.f32 %v3548_v15, %v2568_v36  ;;  %v4159_v36 = vld [vmem:[#allocation7 + $0x28] sm:$0xff] (!%p3549_p12)  }
 0x386   : > { %v2579_v49 = vrot.slane %v2570_v39, %v4857_v13  ;;  %v2583_v40 = vrot.slane %v2570_v39, %v1402_v17  ;;  %v2587_v41 = vrot.slane %v2570_v39, %v1406_v18  ;;  %v2591_v43 = vrot.slane %v2570_v39, %v1410_v16  ;;  %v4164_v39 = vld [vmem:[#allocation7 + $0xb0] sm:$0xff] (!%p3549_p12)  }
 0x387   : > { %v2672_v17 = vrot.slane %v2667_v44, %v4857_v13  ;;  %v2680_v18 = vrot.slane %v2675_v62, %v4857_v13  ;;  %v3550_v62 = vld [vmem:[#allocation8] ss:$0 sm:$0xff] (!%p3549_p12) }
 0x388   : > { %v2596_v61 = vpack.c.bf16 %v2579_v49, %v2579_v49  ;;  %v2597_v1 = vpack.c.bf16 %v2583_v40, %v2583_v40  ;;  %v2598_v2 = vpack.c.bf16 %v2587_v41, %v2587_v41  ;;  %v2599_v4 = vpack.c.bf16 %v2591_v43, %v2591_v43  ;;  %v4165_v49 = vld [vmem:[#allocation7 + $0x78] sm:$0xff] (!%p3549_p12)  }
 0x389   : > { %v4166_v40 = vld [vmem:[#allocation7 + $0xf8] sm:$0xff] (!%p3549_p12)  }
 0x38a   : > { %v2601_v57 = vpack.i.b16 %v2596_v61, %v2596_v61  ;;  %v2608_v8 = vpack.i.b16 %v2597_v1, %v2597_v1  ;;  %v2615_v54 = vpack.i.b16 %v2598_v2, %v2598_v2  ;;  %v2622_v50 = vpack.i.b16 %v2599_v4, %v2599_v4  ;;  %v4167_v41 = vld [vmem:[#allocation7 + $0x38] sm:$0xff] (!%p3549_p12)  }
 0x38b   : > { %v4168_v43 = vld [vmem:[#allocation7 + $0xb8] sm:$0xff] (!%p3549_p12)  }
 0x38c   : > { %v2606_v16 = vrot.slane %v2601_v57, %v4857_v13  ;;  %v2613_v51 = vrot.slane %v2608_v8, %v4857_v13  ;;  %v2620_v52 = vrot.slane %v2615_v54, %v4857_v13  ;;  %v2627_v53 = vrot.slane %v2622_v50, %v4857_v13 }
 0x38e   : > { %v2628_v10 = vmul.bf16 %v2606_v16, %v2571_v12  ;;  %v2629_v11 = vmul.bf16 %v2613_v51, %v2572_v23  ;;  %v2630_v14 = vmul.bf16 %v2620_v52, %v2573_v19  ;;  %v2631_v15 = vmul.bf16 %v2627_v53, %v2574_v28  ;;  %v4143_v12 = vld [vmem:[#allocation7 + $0x8] sm:$0xff] (!%p3549_p12)   ;;  %v4145_v23 = vld [vmem:[#allocation7 + $0x50] sm:$0xff] (!%p3549_p12)  }
 0x38f   : > { %2704 = sbr.rel (%p3549_p12) target bundleno = 1166 (0x48e), region = 64  ;;  %v4144_v19 = vld [vmem:[#allocation7 + $0x88] sm:$0xff] (!%p3549_p12)   ;;  %3601 = vmatpush3.bf16.msra.mxu0 (!%p3549_p12), %v4143_v12  ;;  %v4146_v28 = vld [vmem:[#allocation7 + $0xd0] sm:$0xff] (!%p3549_p12)  }
 0x390   : > { %v2689_v20 = vadd.bf16 %v2664_v59, %v2628_v10  ;;  %v2690_v21 = vadd.bf16 %v2672_v17, %v2629_v11  ;;  %v2691_v22 = vadd.bf16 %v2680_v18, %v2630_v14  ;;  %v2692_v13 = vadd.bf16 %v2688_v45, %v2631_v15  ;;  %3602 = vmatprep.subr.bf16.mxu0 (!%p3549_p12), %v4145_v23 }
 0x392   : > { %v5042_v24 = vmax.bf16 %v4344_v56, %v2689_v20  ;;  %v2694_v55 = vmax.bf16 %v4344_v56, %v2690_v21  ;;  %v5046_v60 = vmax.bf16 %v4344_v56, %v2691_v22  ;;  %v2696_v5 = vmax.bf16 %v4344_v56, %v2692_v13  ;;  %v4142_v56 = vld [vmem:[#allocation7 + $0xc8] sm:$0xff] (!%p3549_p12)  }
 0x393   : > { %3622 = vmatprep.subr.bf16.mxu1 (!%p3549_p12), %v4142_v56  ;;  %3603 = vmatpush3.bf16.msra.mxu0 (!%p3549_p12), %v4147_v25 }
 0x394   : > { %2697 = vst [vmem:[#allocation2] sm:$0xff] %v5042_v24  ;;  %2698 = vst [vmem:[#allocation2 + $0x8] sm:$0xff] %v2694_v55  ;;  %3000 = vmatprep.mubr.bf16.mxu0 (!%p3549_p12), %v2694_v55  ;;  %3041 = vmatprep.mubr.bf16.mxu1 (!%p3549_p12), %v2696_v5 }
 0x395   : > { %2699 = vst [vmem:[#allocation2 + $0x10] sm:$0xff] %v5046_v60  ;;  %2700 = vst [vmem:[#allocation2 + $0x18] sm:$0xff] %v2696_v5  ;;  %3623 = vmatpush3.bf16.msra.mxu1 (!%p3549_p12), %v4144_v19  ;;  %3604 = vmatprep.subr.bf16.mxu0 (!%p3549_p12), %v4149_v27 }
 0x396   : > { %3624 = vmatprep.subr.bf16.mxu1 %v4146_v28 }
 0x397   : > { %3605 = vmatpush3.bf16.msra.mxu0 %v4151_v30 }
 0x398   : > { %3606 = vmatprep.subr.bf16.mxu0 %v4153_v0 }
 0x399   : > { %3625 = vmatpush3.bf16.msra.mxu1 %v4148_v26 }
 0x39a   : > { %3626 = vmatprep.subr.bf16.mxu1 %v4150_v29 }
 0x39b   : > { %3607 = vmatpush3.bf16.msra.mxu0 %v4155_v33 }
 0x39c   : > { %3608 = vmatprep.subr.bf16.mxu0 %v4157_v47 }
 0x39d   : > { %3627 = vmatpush3.bf16.msra.mxu1 %v4152_v31 }
 0x39e   : > { %3628 = vmatprep.subr.bf16.mxu1 %v4154_v32 }
 0x39f   : > { %3609 = vmatpush3.bf16.msra.mxu0 %v4159_v36 }
 0x3a0   : > { %3610 = vmatprep.subr.bf16.mxu0 %v4161_v37 }
 0x3a1   : > { %3629 = vmatpush3.bf16.msra.mxu1 %v4156_v34 }
 0x3a2   : > { %3630 = vmatprep.subr.bf16.mxu1 %v4158_v35 }
 0x3a3   : > { %3611 = vmatpush3.bf16.msra.mxu0 %v4163_v42 }
 0x3a4   : > { %3612 = vmatprep.subr.bf16.mxu0 %v4165_v49 }
 0x3a5   : > { %3631 = vmatpush3.bf16.msra.mxu1 %v4160_v48 }
 0x3a6   : > { %3632 = vmatprep.subr.bf16.mxu1 %v4162_v38 }
 0x3a7   : > { %3613 = vmatpush3.bf16.msra.mxu0 %v4167_v41 }
 0x3a9   : > { %3633 = vmatpush3.bf16.msra.mxu1 %v4164_v39 }
 0x3aa   : > { %3634 = vmatprep.subr.bf16.mxu1 %v4166_v40  ;;  %3001 = vmatmul.mubr.bf16.vlgmr.msra.gmra.mrb[0].mxu0 %v5042_v24 }
 0x3ad   : > { %3635 = vmatpush3.bf16.msra.mxu1 %v4168_v43 }
 0x3b0   : > { %3042 = vmatmul.mubr.bf16.vlgmr.msra.gmra.mrb[0].mxu1 %v5046_v60 }
 0x47d   : > { %v3614_v44 = vpop.f32.mrb[0].mxu0 }
 0x47e   : > { %v3615_v58 = vpop.f32.mrb[1].mxu0 }
 0x47f   : > { %v3616_v61 = vadd.f32 %v3615_v58, %v3614_v44  ;;  %v3617_v2 = vpop.f32.mrb[2].mxu0 }
 0x480   : > { %v3618_v8 = vpop.f32.mrb[3].mxu0 }
 0x481   : > { %v3003_v54 = vadd.f32 %v3616_v61, %v3550_v62  ;;  %v3619_v50 = vadd.f32 %v3618_v8, %v3617_v2 }
 0x483   : > { %v3636_v46 = vpop.f32.mrb[0].mxu1  ;;  %v3006_v45 = vadd.f32 %v3619_v50, %v3550_v62 }
 0x484   : > { %v3637_v1 = vpop.f32.mrb[1].mxu1 }
 0x485   : > { %v3638_v4 = vadd.f32 %v3637_v1, %v3636_v46  ;;  %v3639_v57 = vpop.f32.mrb[2].mxu1 }
 0x486   : > { %v3640_v17 = vpop.f32.mrb[3].mxu1 }
 0x487   : > { %v3641_v59 = vadd.f32 %v3640_v17, %v3639_v57  ;;  %v3044_v18 = vadd.f32 %v3638_v4, %v3003_v54 }
 0x489   : > { %v3047_v16 = vadd.f32 %v3641_v59, %v3006_v45 }
 0x48b   : > { %v3596_v51 = vpack.c.bf16 %v3047_v16, %v3044_v18 }
 0x48d   : > { %3597 = vst [vmem:[%s5075_s5] sm:$0xff] %v3596_v51  }
 0x48e PF: > { %p19_p0 = scmp.ge.s32.totalorder %s4470_s11, 4   ;;  %s5090_s18 = smov %s4323_s19 }
 0x48f   : > { %s5091_s19 = smov %s4327_s20  ;;  %s5092_s20 = smov %s4483_s14 }
 0x490   : > { %s5093_s21 = smov %s4470_s11  ;;  %21 = sbr.rel (!%p19_p0) target bundleno = 6 (0x6), region = 107 }
 0x497   :  { %3071 = vsyncpa [#allocation4], 1 }
 0x498   :  { %3073 = vsyncpa [#allocation4 + $0x1], 1 }
 0x499   :  { %3074 = vsyncpa [#allocation6], 1 }
 0x49a   :  { %3076 = vsyncpa [#allocation6 + $0x1], 1 }
 0x49b   :  { %3077 = vsyncpa [#allocation9], 1 }

</bundles_post_ra>
